<compile_context>
chip_gen: v7x
topology: tpu7x:2x2x1
jax: 0.10.0
libtpu: 0.0.40
codegen_flags: <defaults>
</compile_context>

<pallas_src>
import functools

import jax
import jax.numpy as jnp
from jax.experimental import pallas as pl
from jax.experimental.pallas import tpu as pltpu

_LANE = 128
_LANE_BITS = 7  # log2(_LANE)


def _seq_ce_kernel(logits_ref, targets_ref, mask_ref, out_ref,
                   m_ref, l_ref, t_ref, s_ref, *,
                   label_smoothing, num_classes):
    """Masked per-token NLL with online log-sum-exp over vocab tiles.

    logits_ref : (tm, tv)          input dtype (bf16 / f32)
    targets_ref: (tm, 1)           int32
    mask_ref   : (tm, 1)           float32
    out_ref    : (1, tm//128, 128) float32  lane-dense per-token NLL
    m/l/t/s    : (tm, 1)           float32  running max / exp-sum /
                                            target-logit / logit-sum
    """
    kv = pl.program_id(1)
    nkv = pl.num_programs(1)
    tm, tv = logits_ref.shape

    @pl.when(kv == 0)
    def _init():
        m_ref[...] = jnp.full_like(m_ref, -jnp.inf)
        l_ref[...] = jnp.zeros_like(l_ref)
        t_ref[...] = jnp.zeros_like(t_ref)
        s_ref[...] = jnp.zeros_like(s_ref)

    x = logits_ref[...].astype(jnp.float32)                      # (tm, tv)
    tgt = targets_ref[...]                                       # (tm, 1) i32

    # Global vocab column index of every lane in this tile.
    col = jax.lax.broadcasted_iota(jnp.int32, (tm, tv), 1) + kv * tv
    is_tgt = col == tgt                                          # (tm, tv)

    # Online log-sum-exp update (no (tm, V) log_probs tile is ever built).
    m_prev = m_ref[...]
    m_new = jnp.maximum(m_prev, jnp.max(x, axis=-1, keepdims=True))
    alpha = jnp.exp(m_prev - m_new)
    l_ref[...] = l_ref[...] * alpha + jnp.sum(jnp.exp(x - m_new),
                                              axis=-1, keepdims=True)
    m_ref[...] = m_new

    # Target logit: the target column lives in exactly one vocab tile.
    # NOTE: out-of-range / sentinel targets (e.g. -100) contribute 0 and rely
    # on `mask` zeroing those tokens, matching the previous kernel.
    t_ref[...] = t_ref[...] + jnp.sum(jnp.where(is_tgt, x, 0.0),
                                      axis=-1, keepdims=True)
    if label_smoothing > 0.0:
        s_ref[...] = s_ref[...] + jnp.sum(x, axis=-1, keepdims=True)

    @pl.when(kv == nkv - 1)
    def _finalize():
        lse = m_ref[...] + jnp.log(l_ref[...])                   # (tm, 1)
        if label_smoothing > 0.0:
            # -sum(log_probs * smoothed) = lse - (1-ls)*t - (ls/V)*sum_logits
            nll = (lse
                   - (1.0 - label_smoothing) * t_ref[...]
                   - (label_smoothing / float(num_classes)) * s_ref[...])
        else:
            nll = lse - t_ref[...]
        nll = nll * mask_ref[...].astype(jnp.float32)            # (tm, 1)

        # Lane-dense scatter: out[g, j] = nll[g*128 + j].  Done with a tiny
        # selector matmul on the (otherwise idle) MXU, avoiding a
        # sublane->lane relayout and masked 1-lane output stores.
        g = tm // _LANE
        rk = jax.lax.broadcasted_iota(jnp.int32, (tm, _LANE), 0)
        cj = jax.lax.broadcasted_iota(jnp.int32, (tm, _LANE), 1)
        lane_sel = (jnp.bitwise_and(rk, _LANE - 1) == cj).astype(jnp.float32)
        gg = jax.lax.broadcasted_iota(jnp.int32, (g, tm), 0)
        kk = jax.lax.broadcasted_iota(jnp.int32, (g, tm), 1)
        grp_sel = (jnp.right_shift(kk, _LANE_BITS) == gg).astype(jnp.float32)
        out_ref[0] = jnp.dot(grp_sel, nll * lane_sel,
                             preferred_element_type=jnp.float32)


def _vmem_capacity_bytes():
    try:
        return int(pltpu.get_tpu_info().vmem_capacity_bytes)
    except Exception:
        return 64 * 1024 * 1024      # conservative: v7x per-TensorCore VMEM


def _select_tiles(n_rows, vocab, itemsize, row_tile=None, vocab_tile=None):
    """Pick (tm, tv): tm token rows (multiple of 128), tv vocab lanes (tv | V)."""
    # Budget for the double-buffered logits tile: ~1/3 of this chip's VMEM,
    # capped so scratch + column blocks + headroom always fit (keeps
    # pipelining alive on v7x's 64 MiB as well as v5e/v6e's 128 MiB).
    budget = max(4 << 20, min(_vmem_capacity_bytes() // 3, 48 << 20))
    per_buf = budget // 2

    if vocab_tile is not None:
        tv = int(vocab_tile)
    elif vocab % _LANE != 0 or vocab * itemsize * _LANE <= per_buf:
        # Whole vocab per tile (and the only option if V is not 128-aligned).
        # TODO(synk): vocab sizes that are both huge and not a multiple of 128
        # fall back to a single vocab tile; tiling them needs -inf padding.
        tv = vocab
    else:
        # Largest multiple-of-128 divisor of V whose (128, tv) tile fits.
        tv = _LANE
        cand = 2 * _LANE
        while cand <= vocab:
            if vocab % cand == 0 and cand * itemsize * _LANE <= per_buf:
                tv = cand
            cand += _LANE

    if row_tile is not None:
        tm = int(row_tile)
    else:
        tm = per_buf // max(1, tv * itemsize)
        tm = max(_LANE, min(1024, (tm // _LANE) * _LANE))
        n_cover = -(-n_rows // _LANE) * _LANE
        tm = min(tm, max(_LANE, n_cover))       # don't over-pad tiny problems
    assert tm % _LANE == 0, "row tile must be a multiple of 128"
    return tm, tv


def sequence_cross_entropy_with_logits(logits, targets, mask,
                                       label_smoothing=-1.0, reduce=None,
                                       *, row_tile=None, vocab_tile=None):
    """JAX/Pallas equivalent of the PyTorch reference function.

    logits : (B, S, V) float (bf16 or f32)
    targets: (B, S)    int
    mask   : (B, S)    float
    reduce : None | 'sentence' | 'batch'
    """
    B, S, V = logits.shape
    N = B * S
    itemsize = jnp.dtype(logits.dtype).itemsize

    tm, tv = _select_tiles(N, V, itemsize, row_tile, vocab_tile)
    assert V % tv == 0, "vocab tile must divide the vocab size"
    n_row_tiles = pl.cdiv(N, tm)
    n_pad = n_row_tiles * tm
    n_kv = V // tv
    g = tm // _LANE

    # Keep the logits in their input dtype through the DMA (bf16 halves HBM
    # traffic); the kernel upcasts per tile.
    logits_flat = logits.reshape(N, V)
    targets_flat = targets.reshape(N, 1).astype(jnp.int32)
    mask_flat = mask.reshape(N, 1).astype(jnp.float32)
    if n_pad != N:
        pad = n_pad - N
        logits_flat = jnp.pad(logits_flat, ((0, pad), (0, 0)))
        targets_flat = jnp.pad(targets_flat, ((0, pad), (0, 0)))
        mask_flat = jnp.pad(mask_flat, ((0, pad), (0, 0)))   # padded rows -> 0

    kernel = functools.partial(_seq_ce_kernel,
                               label_smoothing=float(label_smoothing),
                               num_classes=V)

    # Scoped-VMEM limit sized to the chosen tiles (column blocks pad to a full
    # 128-lane tile in VMEM; logits are double-buffered by the pipeline).
    vmem_need = (2 * tm * tv * itemsize          # logits, double buffered
                 + 2 * 2 * tm * _LANE * 4        # targets + mask blocks
                 + 4 * tm * _LANE * 4            # m/l/t/s scratch
                 + 2 * g * _LANE * 4             # lane-dense output
                 + (4 << 20))                    # headroom
    vmem_limit = int(min(_vmem_capacity_bytes(), max(32 << 20, vmem_need)))

    cost = pl.CostEstimate(
        flops=int(6 * n_pad * V),
        transcendentals=int(n_pad * V),
        bytes_accessed=int(n_pad * V * itemsize + n_pad * 12),
    )

    nll = pl.pallas_call(
        kernel,
        out_shape=jax.ShapeDtypeStruct((n_row_tiles, g, _LANE), jnp.float32),
        grid_spec=pltpu.PrefetchScalarGridSpec(
            num_scalar_prefetch=0,
            grid=(n_row_tiles, n_kv),
            in_specs=[
                pl.BlockSpec((tm, tv), lambda i, k: (i, k)),
                pl.BlockSpec((tm, 1), lambda i, k: (i, 0)),
                pl.BlockSpec((tm, 1), lambda i, k: (i, 0)),
            ],
            out_specs=pl.BlockSpec((1, g, _LANE), lambda i, k: (i, 0, 0)),
            scratch_shapes=[pltpu.VMEM((tm, 1), jnp.float32)] * 4,
        ),
        compiler_params=pltpu.CompilerParams(
            dimension_semantics=("parallel", "arbitrary"),
            vmem_limit_bytes=vmem_limit),
        cost_estimate=cost,
    )(logits_flat, targets_flat, mask_flat)

    # per-token masked NLL back to (B, S)
    loss = nll.reshape(n_pad)[:N].reshape(B, S)

    if reduce:
        mask_f = mask.astype(jnp.float32)
        loss = jnp.sum(loss, axis=1) / (jnp.sum(mask_f, axis=1) + 1e-13)
        if reduce == "batch":
            loss = jnp.mean(loss)
    return loss


class SequenceCrossEntropyLoss:
    """Mirror of the (parameter-free) PyTorch nn.Module."""

    def __call__(self, logits, targets, mask, label_smoothing=-1, reduce=None):
        return sequence_cross_entropy_with_logits(
            logits, targets, mask, label_smoothing, reduce)


def _reference(logits, targets, mask, label_smoothing=-1.0, reduce=None):
    """Pure-JAX reference for a correctness check."""
    B, S, V = logits.shape
    lp = jax.nn.log_softmax(logits.reshape(-1, V).astype(jnp.float32), axis=-1)
    tf = targets.reshape(-1).astype(jnp.int32)
    if label_smoothing > 0.0:
        sm = label_smoothing / V
        oh = jax.nn.one_hot(tf, V, dtype=jnp.float32) * (1.0 - label_smoothing) + sm
        nll = -jnp.sum(lp * oh, axis=-1)
    else:
        nll = -jnp.take_along_axis(lp, tf[:, None], axis=1)[:, 0]
    loss = nll.reshape(B, S) * mask.astype(jnp.float32)
    if reduce:
        mask_f = mask.astype(jnp.float32)
        loss = jnp.sum(loss, axis=1) / (jnp.sum(mask_f, axis=1) + 1e-13)
        if reduce == "batch":
            loss = jnp.mean(loss)
    return loss


if __name__ == "__main__":
    loss_fn = SequenceCrossEntropyLoss()

    # --- case 1: module-default small shapes (B=2, S=8, V=128), f32 ---------
    B, S, V = 2, 8, 128
    k1, k2, _ = jax.random.split(jax.random.PRNGKey(0), 3)
    logits = jax.random.normal(k1, (B, S, V), dtype=jnp.float32)
    targets = jax.random.randint(k2, (B, S), 0, V, dtype=jnp.int32)
    mask = jnp.concatenate(
        [jnp.ones((B, S - 2), jnp.float32), jnp.zeros((B, 2), jnp.float32)],
        axis=1)

    out_none = loss_fn(logits, targets, mask)                         # (B, S)
    out_batch = loss_fn(logits, targets, mask, label_smoothing=0.1,
                        reduce="batch")                               # scalar
    jax.block_until_ready((out_none, out_batch))

    assert out_none.shape == (B, S)
    assert out_batch.shape == ()
    assert jnp.allclose(out_none, _reference(logits, targets, mask),
                        atol=1e-5, rtol=1e-5)
    assert jnp.allclose(out_batch,
                        _reference(logits, targets, mask, 0.1, "batch"),
                        atol=1e-5, rtol=1e-5)

    # --- case 2: exercise row tiling, vocab tiling, row padding, bf16 -------
    B2, S2, V2 = 2, 136, 384          # N=272 -> padded to 384 rows
    k3, k4, k5 = jax.random.split(jax.random.PRNGKey(1), 3)
    logits2 = jax.random.normal(k3, (B2, S2, V2),
                                dtype=jnp.float32).astype(jnp.bfloat16)
    targets2 = jax.random.randint(k4, (B2, S2), 0, V2, dtype=jnp.int32)
    mask2 = (jax.random.uniform(k5, (B2, S2)) > 0.2).astype(jnp.float32)

    out2 = sequence_cross_entropy_with_logits(
        logits2, targets2, mask2, label_smoothing=0.1, reduce="sentence",
        row_tile=128, vocab_tile=128)      # grid = (3 row tiles, 3 vocab tiles)
    jax.block_until_ready(out2)
    ref2 = _reference(logits2.astype(jnp.float32), targets2, mask2,
                      0.1, "sentence")
    assert out2.shape == (B2,)
    assert jnp.allclose(out2, ref2, atol=1e-4, rtol=1e-4)

    print("KERNEL_OK")
</pallas_src>

<mosaic_0001>
module attributes {stable_mosaic.version = 11 : i64} {
  func.func @_seq_ce_kernel(%arg0: i32, %arg1: i32, %arg2: memref<128x128xf32, #tpu.memory_space<vmem>>, %arg3: memref<128x1xi32, #tpu.memory_space<vmem>>, %arg4: memref<128x1xf32, #tpu.memory_space<vmem>>, %arg5: memref<1x1x128xf32, #tpu.memory_space<vmem>>, %arg6: memref<128x1xf32, #tpu.memory_space<vmem>>, %arg7: memref<128x1xf32, #tpu.memory_space<vmem>>, %arg8: memref<128x1xf32, #tpu.memory_space<vmem>>, %arg9: memref<128x1xf32, #tpu.memory_space<vmem>>) attributes {dimension_semantics = [#tpu.dimension_semantics<parallel>, #tpu.dimension_semantics<arbitrary>], iteration_bounds = array<i64: 1, 1>, scalar_prefetch = 0 : i64, scratch_operands = 4 : i64, tpu.core_type = #tpu.core_type<tc>, window_params = [{transform_indices = @transform_0, window_bounds = array<i64: 128, 128>}, {transform_indices = @transform_1, window_bounds = array<i64: 128, 1>}, {transform_indices = @transform_2, window_bounds = array<i64: 128, 1>}, {transform_indices = @transform_3, window_bounds = array<i64: 1, 1, 128>}]} {
    %c0_i32 = arith.constant 0 : i32
    %0 = arith.cmpi eq, %arg1, %c0_i32 : i32
    %1 = arith.extui %0 : i1 to i32
    %c0_i32_0 = arith.constant 0 : i32
    %2 = arith.cmpi ne, %1, %c0_i32_0 : i32
    scf.if %2 {
      %cst_21 = arith.constant 0xFF800000 : f32
      %37 = vector.broadcast %cst_21 : f32 to vector<128x1xf32>
      %c0_22 = arith.constant 0 : index
      %c0_23 = arith.constant 0 : index
      %38 = vector.load %arg6[%c0_22, %c0_23] : memref<128x1xf32, #tpu.memory_space<vmem>>, vector<128x1xf32>
      tpu.vector_store %arg6[%c0_22, %c0_23], %37 {strides = array<i32>} : memref<128x1xf32, #tpu.memory_space<vmem>>, vector<128x1xf32>,
      %cst_24 = arith.constant 0.000000e+00 : f32
      %39 = vector.broadcast %cst_24 : f32 to vector<128x1xf32>
      %c0_25 = arith.constant 0 : index
      %c0_26 = arith.constant 0 : index
      %40 = vector.load %arg7[%c0_25, %c0_26] : memref<128x1xf32, #tpu.memory_space<vmem>>, vector<128x1xf32>
      tpu.vector_store %arg7[%c0_25, %c0_26], %39 {strides = array<i32>} : memref<128x1xf32, #tpu.memory_space<vmem>>, vector<128x1xf32>,
      %cst_27 = arith.constant 0.000000e+00 : f32
      %41 = vector.broadcast %cst_27 : f32 to vector<128x1xf32>
      %c0_28 = arith.constant 0 : index
      %c0_29 = arith.constant 0 : index
      %42 = vector.load %arg8[%c0_28, %c0_29] : memref<128x1xf32, #tpu.memory_space<vmem>>, vector<128x1xf32>
      tpu.vector_store %arg8[%c0_28, %c0_29], %41 {strides = array<i32>} : memref<128x1xf32, #tpu.memory_space<vmem>>, vector<128x1xf32>,
      %cst_30 = arith.constant 0.000000e+00 : f32
      %43 = vector.broadcast %cst_30 : f32 to vector<128x1xf32>
      %c0_31 = arith.constant 0 : index
      %c0_32 = arith.constant 0 : index
      %44 = vector.load %arg9[%c0_31, %c0_32] : memref<128x1xf32, #tpu.memory_space<vmem>>, vector<128x1xf32>
      tpu.vector_store %arg9[%c0_31, %c0_32], %43 {strides = array<i32>} : memref<128x1xf32, #tpu.memory_space<vmem>>, vector<128x1xf32>,
    } else {
    }
    %c0 = arith.constant 0 : index
    %c0_1 = arith.constant 0 : index
    %3 = vector.load %arg2[%c0, %c0_1] : memref<128x128xf32, #tpu.memory_space<vmem>>, vector<128x128xf32>
    %c0_2 = arith.constant 0 : index
    %c0_3 = arith.constant 0 : index
    %4 = vector.load %arg3[%c0_2, %c0_3] : memref<128x1xi32, #tpu.memory_space<vmem>>, vector<128x1xi32>
    %5 = tpu.iota {dimensions = array<i32: 1>} : vector<128x128xi32>
    %c128_i32 = arith.constant 128 : i32
    %6 = arith.muli %arg1, %c128_i32 : i32
    %7 = vector.broadcast %6 : i32 to vector<128x128xi32>
    %8 = arith.addi %5, %7 : vector<128x128xi32>
    %9 = vector.broadcast %4 : vector<128x1xi32> to vector<128x128xi32>
    %10 = arith.cmpi eq, %8, %9 : vector<128x128xi32>
    %c0_4 = arith.constant 0 : index
    %c0_5 = arith.constant 0 : index
    %11 = vector.load %arg6[%c0_4, %c0_5] : memref<128x1xf32, #tpu.memory_space<vmem>>, vector<128x1xf32>
    %cst = arith.constant dense<0xFF800000> : vector<128xf32>
    %12 = vector.multi_reduction <maximumf>, %3, %cst [1] : vector<128x128xf32> to vector<128xf32>
    %13 = vector.shape_cast %12 : vector<128xf32> to vector<128x1xf32>
    %14 = arith.maximumf %11, %13 : vector<128x1xf32>
    %15 = arith.subf %11, %14 : vector<128x1xf32>
    %16 = math.exp %15 : vector<128x1xf32>
    %c0_6 = arith.constant 0 : index
    %c0_7 = arith.constant 0 : index
    %17 = vector.load %arg7[%c0_6, %c0_7] : memref<128x1xf32, #tpu.memory_space<vmem>>, vector<128x1xf32>
    %18 = arith.mulf %17, %16 : vector<128x1xf32>
    %19 = vector.broadcast %14 : vector<128x1xf32> to vector<128x128xf32>
    %20 = arith.subf %3, %19 : vector<128x128xf32>
    %21 = math.exp %20 : vector<128x128xf32>
    %cst_8 = arith.constant dense<0.000000e+00> : vector<128xf32>
    %22 = vector.multi_reduction <add>, %21, %cst_8 [1] : vector<128x128xf32> to vector<128xf32>
    %23 = vector.shape_cast %22 : vector<128xf32> to vector<128x1xf32>
    %24 = arith.addf %18, %23 : vector<128x1xf32>
    %c0_9 = arith.constant 0 : index
    %c0_10 = arith.constant 0 : index
    %25 = vector.load %arg7[%c0_9, %c0_10] : memref<128x1xf32, #tpu.memory_space<vmem>>, vector<128x1xf32>
    tpu.vector_store %arg7[%c0_9, %c0_10], %24 {strides = array<i32>} : memref<128x1xf32, #tpu.memory_space<vmem>>, vector<128x1xf32>,
    %c0_11 = arith.constant 0 : index
    %c0_12 = arith.constant 0 : index
    %26 = vector.load %arg6[%c0_11, %c0_12] : memref<128x1xf32, #tpu.memory_space<vmem>>, vector<128x1xf32>
    tpu.vector_store %arg6[%c0_11, %c0_12], %14 {strides = array<i32>} : memref<128x1xf32, #tpu.memory_space<vmem>>, vector<128x1xf32>,
    %c0_13 = arith.constant 0 : index
    %c0_14 = arith.constant 0 : index
    %27 = vector.load %arg8[%c0_13, %c0_14] : memref<128x1xf32, #tpu.memory_space<vmem>>, vector<128x1xf32>
    %cst_15 = arith.constant 0.000000e+00 : f32
    %28 = vector.broadcast %cst_15 : f32 to vector<128x128xf32>
    %29 = arith.select %10, %3, %28 : vector<128x128xi1>, vector<128x128xf32>
    %cst_16 = arith.constant dense<0.000000e+00> : vector<128xf32>
    %30 = vector.multi_reduction <add>, %29, %cst_16 [1] : vector<128x128xf32> to vector<128xf32>
    %31 = vector.shape_cast %30 : vector<128xf32> to vector<128x1xf32>
    %32 = arith.addf %27, %31 : vector<128x1xf32>
    %c0_17 = arith.constant 0 : index
    %c0_18 = arith.constant 0 : index
    %33 = vector.load %arg8[%c0_17, %c0_18] : memref<128x1xf32, #tpu.memory_space<vmem>>, vector<128x1xf32>
    tpu.vector_store %arg8[%c0_17, %c0_18], %32 {strides = array<i32>} : memref<128x1xf32, #tpu.memory_space<vmem>>, vector<128x1xf32>,
    %c0_i32_19 = arith.constant 0 : i32
    %34 = arith.cmpi eq, %arg1, %c0_i32_19 : i32
    %35 = arith.extui %34 : i1 to i32
    %c0_i32_20 = arith.constant 0 : i32
    %36 = arith.cmpi ne, %35, %c0_i32_20 : i32
    scf.if %36 {
      %c0_21 = arith.constant 0 : index
      %c0_22 = arith.constant 0 : index
      %37 = vector.load %arg6[%c0_21, %c0_22] : memref<128x1xf32, #tpu.memory_space<vmem>>, vector<128x1xf32>
      %c0_23 = arith.constant 0 : index
      %c0_24 = arith.constant 0 : index
      %38 = vector.load %arg7[%c0_23, %c0_24] : memref<128x1xf32, #tpu.memory_space<vmem>>, vector<128x1xf32>
      %39 = math.log %38 : vector<128x1xf32>
      %40 = arith.addf %37, %39 : vector<128x1xf32>
      %c0_25 = arith.constant 0 : index
      %c0_26 = arith.constant 0 : index
      %41 = vector.load %arg8[%c0_25, %c0_26] : memref<128x1xf32, #tpu.memory_space<vmem>>, vector<128x1xf32>
      %42 = arith.subf %40, %41 : vector<128x1xf32>
      %c0_27 = arith.constant 0 : index
      %c0_28 = arith.constant 0 : index
      %43 = vector.load %arg4[%c0_27, %c0_28] : memref<128x1xf32, #tpu.memory_space<vmem>>, vector<128x1xf32>
      %44 = arith.mulf %42, %43 : vector<128x1xf32>
      %45 = tpu.iota {dimensions = array<i32: 0>} : vector<128x128xi32>
      %46 = tpu.iota {dimensions = array<i32: 1>} : vector<128x128xi32>
      %c127_i32 = arith.constant 127 : i32
      %47 = vector.broadcast %c127_i32 : i32 to vector<128x128xi32>
      %48 = arith.andi %45, %47 : vector<128x128xi32>
      %49 = arith.cmpi eq, %48, %46 : vector<128x128xi32>
      %50 = arith.extui %49 : vector<128x128xi1> to vector<128x128xi32>
      %51 = arith.sitofp %50 : vector<128x128xi32> to vector<128x128xf32>
      %52 = tpu.iota {dimensions = array<i32: 0>} : vector<1x128xi32>
      %53 = tpu.iota {dimensions = array<i32: 1>} : vector<1x128xi32>
      %c7_i32 = arith.constant 7 : i32
      %54 = vector.broadcast %c7_i32 : i32 to vector<1x128xi32>
      %55 = arith.shrsi %53, %54 : vector<1x128xi32>
      %56 = arith.cmpi eq, %55, %52 : vector<1x128xi32>
      %57 = arith.extui %56 : vector<1x128xi1> to vector<1x128xi32>
      %58 = arith.sitofp %57 : vector<1x128xi32> to vector<1x128xf32>
      %59 = vector.broadcast %44 : vector<128x1xf32> to vector<128x128xf32>
      %60 = arith.mulf %59, %51 : vector<128x128xf32>
      %cst_29 = arith.constant dense<0.000000e+00> : vector<1x128xf32>
      %61 = tpu.matmul %58, %60, %cst_29 {dimension_numbers = #tpu.dot_dimension_numbers<[1], [0], [0], [1], [0, 0, 1, 1], [], []>} : vector<1x128xf32>, vector<128x128xf32>, vector<1x128xf32> -> vector<1x128xf32>
      %c0_30 = arith.constant 0 : index
      %c0_31 = arith.constant 0 : index
      %c0_32 = arith.constant 0 : index
      %62 = vector.load %arg5[%c0_30, %c0_31, %c0_32] : memref<1x1x128xf32, #tpu.memory_space<vmem>>, vector<1x1x128xf32>
      %63 = vector.shape_cast %62 : vector<1x1x128xf32> to vector<1x128xf32>
      %64 = vector.shape_cast %61 : vector<1x128xf32> to vector<1x1x128xf32>
      tpu.vector_store %arg5[%c0_30, %c0_31, %c0_32], %64 {strides = array<i32>} : memref<1x1x128xf32, #tpu.memory_space<vmem>>, vector<1x1x128xf32>,
    } else {
    }
    return
  }
  func.func @transform_0(%arg0: i32, %arg1: i32) -> (i32, i32) {
    %c0_i32 = arith.constant 0 : i32
    return %arg0, %arg1 : i32, i32
  }
  func.func @transform_1(%arg0: i32, %arg1: i32) -> (i32, i32) {
    %c0_i32 = arith.constant 0 : i32
    %c0_i32_0 = arith.constant 0 : i32
    return %arg0, %c0_i32 : i32, i32
  }
  func.func @transform_2(%arg0: i32, %arg1: i32) -> (i32, i32) {
    %c0_i32 = arith.constant 0 : i32
    %c0_i32_0 = arith.constant 0 : i32
    return %arg0, %c0_i32 : i32, i32
  }
  func.func @transform_3(%arg0: i32, %arg1: i32) -> (i32, i32, i32) {
    %c0_i32 = arith.constant 0 : i32
    %c0_i32_0 = arith.constant 0 : i32
    %c0_i32_1 = arith.constant 0 : i32
    return %arg0, %c0_i32, %c0_i32_0 : i32, i32, i32
  }
}

</mosaic_0001>

<bundles_post_ra>
// kernel: tpu_custom_call.1
= control target key start
LH: loop header
LB: loop body
LE: loop exit
PB: predicated region body
PF: predicated region fallthrough
CT: control target
= control target key end

     0   :  { %v1270_v4 = vmov 0   ;;  %vm19_vm0 = vcmask 7168   ;;  %s1934_s0 = inlined_call_operand.vmem [shape: f32[128,128], index: 0, kind: input, shape index: {}]   ;;  %s1935_s1 = inlined_call_operand.vmem [shape: s32[128,1], index: 1, kind: input, shape index: {}]   ;;  %s1936_s2 = inlined_call_operand.vmem [shape: f32[128,1], index: 2, kind: input, shape index: {}]   ;;  %s1937_s3 = inlined_call_operand.hbm [shape: f32[1,1,128], index: 3, kind: output, shape index: {}]  }
   0x1   :  { %v1300_v0 = vld [vmem:[%s1934_s0 + $0x10] sm:$0xff]  ;;  %v1305_v1 = vld [vmem:[%s1934_s0] sm:$0xff]  ;;  %v1312_v2 = vld [vmem:[%s1934_s0 + $0x18] sm:$0xff]  ;;  %1148 = vset.pattern.permute.xlu1 %v1270_v4  ;;  %1149 = vset.pattern.permute.xlu0 %v1270_v4 }
   0x2   :  { %205 = vmax.xlane.f32.xlu1 %v1300_v0  ;;  %201 = vmax.xlane.f32.xlu0 %v1305_v1  ;;  %v1317_v3 = vld [vmem:[%s1934_s0 + $0x8] sm:$0xff]  ;;  %v1329_v6 = vld [vmem:[%s1934_s0 + $0x20] sm:$0xff] }
   0x3   :  { %v1324_v5 = vld [vmem:[%s1934_s0 + $0x28] sm:$0xff] }
   0x6   :  { %207 = vmax.xlane.f32.xlu1 %v1312_v2  ;;  %203 = vmax.xlane.f32.xlu0 %v1317_v3 }
   0x7   :  { %8 = vsyncpa [#allocation7], 0  ;;  %v1271_v7 = vmov -inf   ;;  %v1352_v8 = vld [vmem:[%s1934_s0 + $0x38] sm:$0xff]  ;;  %v1357_v9 = vld [vmem:[%s1934_s0 + $0x30] sm:$0xff]  ;;  %v1938_v16 = vmov 0.0  }
   0x8   :  { %22 = vst.msk [vmem:[#allocation2 + $0x10] sm:$0xff] %vm19_vm0, %v1271_v7  ;;  %20 = vst.msk [vmem:[#allocation2] sm:$0xff] %vm19_vm0, %v1271_v7  ;;  %v1364_v10 = vld [vmem:[%s1934_s0 + $0x48] sm:$0xff]  ;;  %v1369_v11 = vld [vmem:[%s1934_s0 + $0x40] sm:$0xff] }
   0x9   :  { %21 = vst.msk [vmem:[#allocation2 + $0x8] sm:$0xff] %vm19_vm0, %v1271_v7  ;;  %23 = vst.msk [vmem:[#allocation2 + $0x18] sm:$0xff] %vm19_vm0, %v1271_v7  ;;  %v1376_v12 = vld [vmem:[%s1934_s0 + $0x58] sm:$0xff]  ;;  %v1381_v13 = vld [vmem:[%s1934_s0 + $0x50] sm:$0xff] }
   0xa   :  { %24 = vst.msk [vmem:[#allocation2 + $0x20] sm:$0xff] %vm19_vm0, %v1271_v7  ;;  %25 = vst.msk [vmem:[#allocation2 + $0x28] sm:$0xff] %vm19_vm0, %v1271_v7  ;;  %211 = vmax.xlane.f32.xlu1 %v1324_v5  ;;  %209 = vmax.xlane.f32.xlu0 %v1329_v6  ;;  %v1388_v14 = vld [vmem:[%s1934_s0 + $0x68] sm:$0xff]  ;;  %v1393_v15 = vld [vmem:[%s1934_s0 + $0x60] sm:$0xff] }
   0xb   :  { %26 = vst.msk [vmem:[#allocation2 + $0x30] sm:$0xff] %vm19_vm0, %v1271_v7  ;;  %27 = vst.msk [vmem:[#allocation2 + $0x38] sm:$0xff] %vm19_vm0, %v1271_v7  ;;  %v1464_v17 = vld [vmem:[%s1934_s0 + $0x78] sm:$0xff]  ;;  %v1469_v18 = vld [vmem:[%s1934_s0 + $0x70] sm:$0xff] }
   0xc   :  { %28 = vst.msk [vmem:[#allocation2 + $0x40] sm:$0xff] %vm19_vm0, %v1271_v7  ;;  %29 = vst.msk [vmem:[#allocation2 + $0x48] sm:$0xff] %vm19_vm0, %v1271_v7  ;;  %v100_v19 = vld [vmem:[%s1935_s1] sm:$0xff]  ;;  %v102_v20 = vld [vmem:[%s1935_s1 + $0x10] sm:$0xff] }
   0xd   :  { %30 = vst.msk [vmem:[#allocation2 + $0x50] sm:$0xff] %vm19_vm0, %v1271_v7  ;;  %31 = vst.msk [vmem:[#allocation2 + $0x58] sm:$0xff] %vm19_vm0, %v1271_v7  ;;  %v101_v21 = vld [vmem:[%s1935_s1 + $0x8] sm:$0xff]  ;;  %v104_v22 = vld [vmem:[%s1935_s1 + $0x20] sm:$0xff] }
   0xe   :  { %32 = vst.msk [vmem:[#allocation2 + $0x60] sm:$0xff] %vm19_vm0, %v1271_v7  ;;  %33 = vst.msk [vmem:[#allocation2 + $0x68] sm:$0xff] %vm19_vm0, %v1271_v7  ;;  %215 = vmax.xlane.f32.xlu1 %v1352_v8  ;;  %213 = vmax.xlane.f32.xlu0 %v1357_v9  ;;  %v103_v35 = vld [vmem:[%s1935_s1 + $0x18] sm:$0xff]  ;;  %v105_v43 = vld [vmem:[%s1935_s1 + $0x28] sm:$0xff] }
   0xf   :  { %34 = vst.msk [vmem:[#allocation2 + $0x70] sm:$0xff] %vm19_vm0, %v1271_v7  ;;  %35 = vst.msk [vmem:[#allocation2 + $0x78] sm:$0xff] %vm19_vm0, %v1271_v7  ;;  %v1485_v23 = vld [vmem:[#allocation2 + $0x10] sm:$0xff]  ;;  %v1487_v24 = vld [vmem:[#allocation2] sm:$0xff] }
  0x10   :  { %52 = vst.msk [vmem:[#allocation4] sm:$0xff] %vm19_vm0, %v1938_v16  ;;  %36 = vst.msk [vmem:[#allocation3] sm:$0xff] %vm19_vm0, %v1938_v16  ;;  %v1495_v29 = vld [vmem:[#allocation2 + $0x18] sm:$0xff]  ;;  %v1497_v30 = vld [vmem:[#allocation2 + $0x8] sm:$0xff] }
  0x11   :  { %37 = vst.msk [vmem:[#allocation3 + $0x8] sm:$0xff] %vm19_vm0, %v1938_v16  ;;  %38 = vst.msk [vmem:[#allocation3 + $0x10] sm:$0xff] %vm19_vm0, %v1938_v16  ;;  %v1517_v38 = vld [vmem:[#allocation2 + $0x28] sm:$0xff]  ;;  %v1519_v39 = vld [vmem:[#allocation2 + $0x20] sm:$0xff] }
  0x12   :  { %219 = vmax.xlane.f32.xlu1 %v1364_v10  ;;  %217 = vmax.xlane.f32.xlu0 %v1369_v11  ;;  %39 = vst.msk [vmem:[#allocation3 + $0x18] sm:$0xff] %vm19_vm0, %v1938_v16  ;;  %40 = vst.msk [vmem:[#allocation3 + $0x20] sm:$0xff] %vm19_vm0, %v1938_v16  ;;  %v1539_v47 = vld [vmem:[#allocation2 + $0x38] sm:$0xff]  ;;  %v1541_v48 = vld [vmem:[#allocation2 + $0x30] sm:$0xff] }
  0x13   :  { %41 = vst.msk [vmem:[#allocation3 + $0x28] sm:$0xff] %vm19_vm0, %v1938_v16  ;;  %42 = vst.msk [vmem:[#allocation3 + $0x30] sm:$0xff] %vm19_vm0, %v1938_v16  ;;  %v1558_v55 = vld [vmem:[#allocation2 + $0x48] sm:$0xff]  ;;  %v1560_v56 = vld [vmem:[#allocation2 + $0x40] sm:$0xff] }
  0x14   :  { %43 = vst.msk [vmem:[#allocation3 + $0x38] sm:$0xff] %vm19_vm0, %v1938_v16  ;;  %44 = vst.msk [vmem:[#allocation3 + $0x40] sm:$0xff] %vm19_vm0, %v1938_v16  ;;  %v1577_v63 = vld [vmem:[#allocation2 + $0x58] sm:$0xff]  ;;  %v1579_v4 = vld [vmem:[#allocation2 + $0x50] sm:$0xff] }
  0x15   :  { %45 = vst.msk [vmem:[#allocation3 + $0x48] sm:$0xff] %vm19_vm0, %v1938_v16  ;;  %46 = vst.msk [vmem:[#allocation3 + $0x50] sm:$0xff] %vm19_vm0, %v1938_v16  ;;  %v110_v58 = vld [vmem:[%s1935_s1 + $0x50] sm:$0xff] }
  0x16   :  { %223 = vmax.xlane.f32.xlu1 %v1376_v12  ;;  %221 = vmax.xlane.f32.xlu0 %v1381_v13  ;;  %47 = vst.msk [vmem:[#allocation3 + $0x58] sm:$0xff] %vm19_vm0, %v1938_v16  ;;  %48 = vst.msk [vmem:[#allocation3 + $0x60] sm:$0xff] %vm19_vm0, %v1938_v16 }
  0x17   :  { %49 = vst.msk [vmem:[#allocation3 + $0x68] sm:$0xff] %vm19_vm0, %v1938_v16  ;;  %50 = vst.msk [vmem:[#allocation3 + $0x70] sm:$0xff] %vm19_vm0, %v1938_v16 }
  0x18   :  { %51 = vst.msk [vmem:[#allocation3 + $0x78] sm:$0xff] %vm19_vm0, %v1938_v16  ;;  %53 = vst.msk [vmem:[#allocation4 + $0x8] sm:$0xff] %vm19_vm0, %v1938_v16 }
  0x19   :  { %54 = vst.msk [vmem:[#allocation4 + $0x10] sm:$0xff] %vm19_vm0, %v1938_v16  ;;  %55 = vst.msk [vmem:[#allocation4 + $0x18] sm:$0xff] %vm19_vm0, %v1938_v16 }
  0x1a   :  { %227 = vmax.xlane.f32.xlu1 %v1388_v14  ;;  %225 = vmax.xlane.f32.xlu0 %v1393_v15  ;;  %56 = vst.msk [vmem:[#allocation4 + $0x20] sm:$0xff] %vm19_vm0, %v1938_v16  ;;  %57 = vst.msk [vmem:[#allocation4 + $0x28] sm:$0xff] %vm19_vm0, %v1938_v16 }
  0x1b   :  { %58 = vst.msk [vmem:[#allocation4 + $0x30] sm:$0xff] %vm19_vm0, %v1938_v16  ;;  %59 = vst.msk [vmem:[#allocation4 + $0x38] sm:$0xff] %vm19_vm0, %v1938_v16 }
  0x1c   :  { %60 = vst.msk [vmem:[#allocation4 + $0x40] sm:$0xff] %vm19_vm0, %v1938_v16  ;;  %61 = vst.msk [vmem:[#allocation4 + $0x48] sm:$0xff] %vm19_vm0, %v1938_v16 }
  0x1d   :  { %62 = vst.msk [vmem:[#allocation4 + $0x50] sm:$0xff] %vm19_vm0, %v1938_v16  ;;  %63 = vst.msk [vmem:[#allocation4 + $0x58] sm:$0xff] %vm19_vm0, %v1938_v16 }
  0x1e   :  { %64 = vst.msk [vmem:[#allocation4 + $0x60] sm:$0xff] %vm19_vm0, %v1938_v16  ;;  %65 = vst.msk [vmem:[#allocation4 + $0x68] sm:$0xff] %vm19_vm0, %v1938_v16  ;;  %231 = vmax.xlane.f32.xlu1 %v1464_v17  ;;  %229 = vmax.xlane.f32.xlu0 %v1469_v18 }
  0x1f   :  { %66 = vst.msk [vmem:[#allocation4 + $0x70] sm:$0xff] %vm19_vm0, %v1938_v16  ;;  %67 = vst.msk [vmem:[#allocation4 + $0x78] sm:$0xff] %vm19_vm0, %v1938_v16 }
  0x2f   :  { %122 = vperm.xlu1 %1148, %v100_v19   ;;  %v106_v19 = vld [vmem:[%s1935_s1 + $0x30] sm:$0xff] }
  0x33   :  { %128 = vperm.xlu1 %1148, %v102_v20  }
  0x34   :  { %125 = vperm.xlu0 %1149, %v101_v21  }
  0x37   :  { %134 = vperm.xlu1 %1148, %v104_v22  }
  0x8f   :  { %v206_v25 = vpop.xlane.xlu1 %205  ;;  %v202_v26 = vpop.xlane.xlu0 %201 }
  0x90   :  { %v1490_v27 = vmax.f32 %v1485_v23, %v206_v25  ;;  %v1493_v28 = vmax.f32 %v1487_v24, %v202_v26  ;;  %v1597_v26 = vld [vmem:[#allocation2 + $0x68] sm:$0xff] }
  0x92   :  { %524 = vst.msk [vmem:[#allocation2 + $0x10] sm:$0xff] %vm19_vm0, %v1490_v27  ;;  %522 = vst.msk [vmem:[#allocation2] sm:$0xff] %vm19_vm0, %v1493_v28  ;;  %331 = vperm.xlu0 %1149, %v1493_v28  }
  0x93   :  { %v208_v33 = vpop.xlane.xlu1 %207  ;;  %v204_v34 = vpop.xlane.xlu0 %203 }
  0x94   :  { %v1512_v36 = vmax.f32 %v1495_v29, %v208_v33  ;;  %v1515_v37 = vmax.f32 %v1497_v30, %v204_v34  ;;  %v1599_v33 = vld [vmem:[#allocation2 + $0x60] sm:$0xff] }
  0x95   :  { %1945 = vst [vmem:[#allocation9_spill] sm:$0xff] %v1599_v33 }
  0x96   :  { %525 = vst.msk [vmem:[#allocation2 + $0x18] sm:$0xff] %vm19_vm0, %v1512_v36  ;;  %523 = vst.msk [vmem:[#allocation2 + $0x8] sm:$0xff] %vm19_vm0, %v1515_v37  ;;  %336 = vperm.xlu1 %1148, %v1515_v37   ;;  %131 = vperm.xlu0 %1149, %v103_v35  }
  0x97   :  { %v212_v42 = vpop.xlane.xlu1 %211  ;;  %v210_v44 = vpop.xlane.xlu0 %209 }
  0x98   :  { %v1534_v45 = vmax.f32 %v1517_v38, %v212_v42  ;;  %v1537_v46 = vmax.f32 %v1519_v39, %v210_v44 }
  0x9a   :  { %527 = vst.msk [vmem:[#allocation2 + $0x28] sm:$0xff] %vm19_vm0, %v1534_v45  ;;  %341 = vperm.xlu1 %1148, %v1490_v27   ;;  %137 = vperm.xlu0 %1149, %v105_v43   ;;  %526 = vst.msk [vmem:[#allocation2 + $0x20] sm:$0xff] %vm19_vm0, %v1537_v46 }
  0x9b   :  { %v216_v51 = vpop.xlane.xlu1 %215  ;;  %v214_v52 = vpop.xlane.xlu0 %213 }
  0x9c   :  { %v1553_v53 = vmax.f32 %v1539_v47, %v216_v51  ;;  %v1556_v54 = vmax.f32 %v1541_v48, %v214_v52  ;;  %v1617_v52 = vld [vmem:[#allocation2 + $0x78] sm:$0xff] }
  0x9e   :  { %529 = vst.msk [vmem:[#allocation2 + $0x38] sm:$0xff] %vm19_vm0, %v1553_v53  ;;  %346 = vperm.xlu1 %1148, %v1512_v36   ;;  %528 = vst.msk [vmem:[#allocation2 + $0x30] sm:$0xff] %vm19_vm0, %v1556_v54 }
  0x9f   :  { %v220_v59 = vpop.xlane.xlu1 %219  ;;  %v218_v60 = vpop.xlane.xlu0 %217 }
  0xa0   :  { %v1572_v61 = vmax.f32 %v1558_v55, %v220_v59  ;;  %v1575_v62 = vmax.f32 %v1560_v56, %v218_v60  ;;  %v1619_v59 = vld [vmem:[#allocation2 + $0x70] sm:$0xff] }
  0xa1   :  { %1947 = vst [vmem:[#allocation11_spill] sm:$0xff] %v1619_v59 }
  0xa2   :  { %531 = vst.msk [vmem:[#allocation2 + $0x48] sm:$0xff] %vm19_vm0, %v1572_v61  ;;  %351 = vperm.xlu1 %1148, %v1537_v46   ;;  %376 = vperm.xlu0 %1149, %v1572_v61   ;;  %530 = vst.msk [vmem:[#allocation2 + $0x40] sm:$0xff] %vm19_vm0, %v1575_v62 }
  0xa3   :  { %v224_v20 = vpop.xlane.xlu1 %223  ;;  %v222_v21 = vpop.xlane.xlu0 %221 }
  0xa4   :  { %v1592_v22 = vmax.f32 %v1577_v63, %v224_v20  ;;  %v1595_v25 = vmax.f32 %v1579_v4, %v222_v21  ;;  %v107_v21 = vld [vmem:[%s1935_s1 + $0x38] sm:$0xff] }
  0xa6   :  { %533 = vst.msk [vmem:[#allocation2 + $0x58] sm:$0xff] %vm19_vm0, %v1592_v22  ;;  %356 = vperm.xlu1 %1148, %v1534_v45   ;;  %386 = vperm.xlu0 %1149, %v1592_v22   ;;  %532 = vst.msk [vmem:[#allocation2 + $0x50] sm:$0xff] %vm19_vm0, %v1595_v25 }
  0xa7   :  { %v228_v42 = vpop.xlane.xlu1 %227  ;;  %v226_v43 = vpop.xlane.xlu0 %225 }
  0xa8   :  { %v1612_v44 = vmax.f32 %v1597_v26, %v228_v42  ;;  %v1615_v51 = vmax.f32 %v1599_v33, %v226_v43 }
  0xaa   :  { %1946 = vst [vmem:[#allocation10_spill] sm:$0xff] %v1615_v51  ;;  %535 = vst.msk [vmem:[#allocation2 + $0x68] sm:$0xff] %vm19_vm0, %v1612_v44  ;;  %361 = vperm.xlu1 %1148, %v1556_v54   ;;  %396 = vperm.xlu0 %1149, %v1612_v44  }
  0xab   :  { %534 = vst.msk [vmem:[#allocation2 + $0x60] sm:$0xff] %vm19_vm0, %v1615_v51  ;;  %v232_v42 = vpop.xlane.xlu1 %231  ;;  %v230_v43 = vpop.xlane.xlu0 %229 }
  0xac   :  { %v1635_v16 = vmax.f32 %v1617_v52, %v232_v42  ;;  %v1638_v35 = vmax.f32 %v1619_v59, %v230_v43  ;;  %v111_v42 = vld [vmem:[%s1935_s1 + $0x58] sm:$0xff]  ;;  %v113_v43 = vld [vmem:[%s1935_s1 + $0x68] sm:$0xff] }
  0xae   :  { %1948 = vst [vmem:[#allocation12_spill] sm:$0xff] %v1638_v35  ;;  %366 = vperm.xlu1 %1148, %v1553_v53   ;;  %143 = vperm.xlu0 %1149, %v107_v21   ;;  %537 = vst.msk [vmem:[#allocation2 + $0x78] sm:$0xff] %vm19_vm0, %v1635_v16  ;;  %v109_v21 = vld [vmem:[%s1935_s1 + $0x48] sm:$0xff] }
  0xaf   :  { %536 = vst.msk [vmem:[#allocation2 + $0x70] sm:$0xff] %vm19_vm0, %v1638_v35  ;;  %v123_v20 = vpop.permute.xlu1 %122 }
  0xb2   :  { %371 = vperm.xlu1 %1148, %v1575_v62   ;;  %406 = vperm.xlu0 %1149, %v1635_v16  }
  0xb3   :  { %v126_v31 = vpop.permute.xlu0 %125 }
  0xb6   :  { %381 = vperm.xlu1 %1148, %v1595_v25   ;;  %149 = vperm.xlu0 %1149, %v109_v21   ;;  %v115_v21 = vld [vmem:[%s1935_s1 + $0x78] sm:$0xff] }
  0xba   :  { %391 = vperm.xlu1 %1148, %v1615_v51   ;;  %155 = vperm.xlu0 %1149, %v111_v42   ;;  %v108_v42 = vld [vmem:[%s1935_s1 + $0x40] sm:$0xff] }
  0xbe   :  { %401 = vperm.xlu1 %1148, %v1638_v35   ;;  %161 = vperm.xlu0 %1149, %v113_v43   ;;  %v112_v43 = vld [vmem:[%s1935_s1 + $0x60] sm:$0xff] }
  0xc2   :  { %140 = vperm.xlu1 %1148, %v106_v19   ;;  %167 = vperm.xlu0 %1149, %v115_v21   ;;  %v114_v19 = vld [vmem:[%s1935_s1 + $0x70] sm:$0xff]  ;;  %v1940_v21 = vlaneseq }
  0xc4   :  { %v1682_v50 = vand.u32 127, %v1940_v21 }
  0xc6   :  { %146 = vperm.xlu1 %1148, %v108_v42   ;;  %v129_v42 = vpop.permute.xlu1 %128  ;;  %vm169_vm1 = vcmp.eq.s32.totalorder %v1682_v50, %v123_v20  ;;  %vm170_vm4 = vcmp.eq.s32.totalorder %v1682_v50, %v126_v31 }
  0xc7   :  { %vm171_vm2 = vcmp.eq.s32.totalorder %v1682_v50, %v129_v42  ;;  %v555_v21 = vsel %vm170_vm4, %v1317_v3, 0.0 }
  0xca   :  { %152 = vperm.xlu1 %1148, %v110_v58   ;;  %v554_v58 = vsel %vm169_vm1, %v1305_v1, 0.0  ;;  %v135_v60 = vpop.permute.xlu1 %134 }
  0xcb   :  { %vm173_vm3 = vcmp.eq.s32.totalorder %v1682_v50, %v135_v60 }
  0xce   :  { %158 = vperm.xlu1 %1148, %v112_v43   ;;  %v556_v43 = vsel %vm171_vm2, %v1300_v0, 0.0 }
  0xd2   :  { %164 = vperm.xlu1 %1148, %v114_v19   ;;  %v558_v19 = vsel %vm173_vm3, %v1329_v6, 0.0 }
  0xe1   :  { %570 = vadd.xlane.f32.xlu0 %v554_v58 }
  0xe5   :  { %574 = vadd.xlane.f32.xlu0 %v556_v43 }
  0xe9   :  { %578 = vadd.xlane.f32.xlu0 %v558_v19 }
  0xf6   :  { %572 = vadd.xlane.f32.xlu1 %v555_v21 }
 0x111   :  { %v332_v20 = vpop.permute.xlu0 %331 }
 0x112   :  { %v409_v31 = vsub.f32 %v1305_v1, %v332_v20 }
 0x114   :  { %v425_v57 = vmul.f32 1.442695, %v409_v31 }
 0x115   :  { %v337_v34 = vpop.permute.xlu1 %336  ;;  %v132_v41 = vpop.permute.xlu0 %131 }
 0x116   :  { %vm172_vm5 = vcmp.eq.s32.totalorder %v1682_v50, %v132_v41  ;;  %1150 = vpow2.f32 %v425_v57 }
 0x117   :  { %v557_v42 = vsel %vm172_vm5, %v1312_v2, 0.0 }
 0x118   :  { %576 = vadd.xlane.f32.xlu1 %v557_v42 }
 0x119   :  { %v342_v58 = vpop.permute.xlu1 %341  ;;  %v138_v60 = vpop.permute.xlu0 %137 }
 0x11a   :  { %vm174_vm6 = vcmp.eq.s32.totalorder %v1682_v50, %v138_v60 }
 0x11b   :  { %v559_v43 = vsel %vm174_vm6, %v1324_v5, 0.0 }
 0x11c   :  { %580 = vadd.xlane.f32.xlu1 %v559_v43 }
 0x11d   :  { %v347_v19 = vpop.permute.xlu1 %346 }
 0x11e   :  { %v412_v49 = vsub.f32 %v1312_v2, %v347_v19 }
 0x120   :  { %v431_v32 = vmul.f32 1.442695, %v412_v49  ;;  %v1151_v20 = vpop.eup %1150 }
 0x121   :  { %v352_v7 = vpop.permute.xlu1 %351  ;;  %v377_v21 = vpop.permute.xlu0 %376 }
 0x122   :  { %1152 = vpow2.f32 %v431_v32  ;;  %v418_v2 = vsub.f32 %v1364_v10, %v377_v21 }
 0x124   :  { %v443_v32 = vmul.f32 1.442695, %v418_v2 }
 0x125   :  { %v357_v40 = vpop.permute.xlu1 %356  ;;  %v387_v41 = vpop.permute.xlu0 %386 }
 0x126   :  { %v414_v42 = vsub.f32 %v1324_v5, %v357_v40  ;;  %v410_v5 = vsub.f32 %v1317_v3, %v337_v34  ;;  %v420_v40 = vsub.f32 %v1376_v12, %v387_v41  ;;  %v413_v34 = vsub.f32 %v1329_v6, %v352_v7 }
 0x128   :  { %v435_v60 = vmul.f32 1.442695, %v414_v42  ;;  %v427_v31 = vmul.f32 1.442695, %v410_v5  ;;  %v411_v42 = vsub.f32 %v1300_v0, %v342_v58  ;;  %v433_v0 = vmul.f32 1.442695, %v413_v34 }
 0x129   :  { %v362_v35 = vpop.permute.xlu1 %361  ;;  %v397_v59 = vpop.permute.xlu0 %396 }
 0x12a   :  { %1154 = vpow2.f32 %v435_v60  ;;  %v422_v21 = vsub.f32 %v1388_v14, %v397_v59  ;;  %v429_v3 = vmul.f32 1.442695, %v411_v42  ;;  %v415_v58 = vsub.f32 %v1357_v9, %v362_v35 }
 0x12c   :  { %v451_v41 = vmul.f32 1.442695, %v422_v21  ;;  %v437_v7 = vmul.f32 1.442695, %v415_v58 }
 0x12d   :  { %v367_v51 = vpop.permute.xlu1 %366  ;;  %v144_v43 = vpop.permute.xlu0 %143 }
 0x12e   :  { %v416_v33 = vsub.f32 %v1352_v8, %v367_v51  ;;  %vm176_vm7 = vcmp.eq.s32.totalorder %v1682_v50, %v144_v43  ;;  %v1153_v51 = vpop.eup %1152 }
 0x12f   :  { %v561_v1 = vsel %vm176_vm7, %v1352_v8, 0.0  ;;  %v447_v8 = vmul.f32 1.442695, %v420_v40 }
 0x130   :  { %584 = vadd.xlane.f32.xlu1 %v561_v1  ;;  %v439_v57 = vmul.f32 1.442695, %v416_v33 }
 0x131   :  { %v372_v49 = vpop.permute.xlu1 %371  ;;  %v407_v60 = vpop.permute.xlu0 %406 }
 0x132   :  { %1156 = vpow2.f32 %v439_v57  ;;  %v424_v1 = vsub.f32 %v1464_v17, %v407_v60 }
 0x133   :  { %1158 = vpow2.f32 %v443_v32  ;;  %v417_v32 = vsub.f32 %v1369_v11, %v372_v49 }
 0x134   :  { %457 = vadd.xlane.f32.xlu1 %v1151_v20  ;;  %v1155_v43 = vpop.eup %1154  ;;  %1160 = vpow2.f32 %v427_v31  ;;  %v455_v59 = vmul.f32 1.442695, %v424_v1 }
 0x135   :  { %v382_v19 = vpop.permute.xlu1 %381  ;;  %1162 = vpow2.f32 %v447_v8  ;;  %v150_v31 = vpop.permute.xlu0 %149  ;;  %v441_v35 = vmul.f32 1.442695, %v417_v32 }
 0x136   :  { %1164 = vpow2.f32 %v429_v3  ;;  %v419_v42 = vsub.f32 %v1381_v13, %v382_v19  ;;  %vm178_vm9 = vcmp.eq.s32.totalorder %v1682_v50, %v150_v31 }
 0x137   :  { %1166 = vpow2.f32 %v451_v41 }
 0x138   :  { %463 = vadd.xlane.f32.xlu1 %v1153_v51  ;;  %1168 = vpow2.f32 %v433_v0 }
 0x139   :  { %v392_v33 = vpop.permute.xlu1 %391  ;;  %1170 = vpow2.f32 %v455_v59 }
 0x13a   :  { %1172 = vpow2.f32 %v437_v7  ;;  %v421_v60 = vsub.f32 %v1393_v15, %v392_v33 }
 0x13b   :  { %1174 = vpow2.f32 %v441_v35 }
 0x13c   :  { %467 = vadd.xlane.f32.xlu1 %v1155_v43  ;;  %v1157_v57 = vpop.eup %1156  ;;  %v156_v43 = vpop.permute.xlu0 %155  ;;  %v449_v34 = vmul.f32 1.442695, %v421_v60 }
 0x13d   :  { %v402_v2 = vpop.permute.xlu1 %401  ;;  %v1159_v5 = vpop.eup %1158  ;;  %vm180_vm10 = vcmp.eq.s32.totalorder %v1682_v50, %v156_v43 }
 0x13e   :  { %v1161_v40 = vpop.eup %1160  ;;  %v423_v41 = vsub.f32 %v1469_v18, %v402_v2  ;;  %v565_v58 = vsel %vm180_vm10, %v1376_v12, 0.0 }
 0x13f   :  { %v1163_v51 = vpop.eup %1162 }
 0x140   :  { %471 = vadd.xlane.f32.xlu1 %v1157_v57  ;;  %v1165_v8 = vpop.eup %1164  ;;  %v162_v1 = vpop.permute.xlu0 %161  ;;  %v563_v57 = vsel %vm178_vm9, %v1364_v10, 0.0  ;;  %v453_v33 = vmul.f32 1.442695, %v423_v41 }
 0x141   :  { %v141_v20 = vpop.permute.xlu1 %140  ;;  %v1167_v21 = vpop.eup %1166  ;;  %vm182_vm11 = vcmp.eq.s32.totalorder %v1682_v50, %v162_v1  ;;  %v543_v1 = vld [vmem:[#allocation4 + $0x28] sm:$0xff] }
 0x142   :  { %vm175_vm8 = vcmp.eq.s32.totalorder %v1682_v50, %v141_v20  ;;  %v1169_v49 = vpop.eup %1168 }
 0x143   :  { %v560_v6 = vsel %vm175_vm8, %v1357_v9, 0.0  ;;  %v445_v9 = vmul.f32 1.442695, %v419_v42  ;;  %v1171_v3 = vpop.eup %1170 }
 0x144   :  { %582 = vadd.xlane.f32.xlu0 %v560_v6  ;;  %475 = vadd.xlane.f32.xlu1 %v1159_v5  ;;  %v1173_v19 = vpop.eup %1172  ;;  %v168_v59 = vpop.permute.xlu0 %167  ;;  %v567_v5 = vsel %vm182_vm11, %v1388_v14, 0.0 }
 0x145   :  { %1176 = vpow2.f32 %v445_v9  ;;  %v1175_v0 = vpop.eup %1174  ;;  %v147_v20 = vpop.permute.xlu1 %146  ;;  %vm184_vm12 = vcmp.eq.s32.totalorder %v1682_v50, %v168_v59 }
 0x146   :  { %1178 = vpow2.f32 %v449_v34  ;;  %v569_v6 = vsel %vm184_vm12, %v1464_v17, 0.0  ;;  %vm177_vm13 = vcmp.eq.s32.totalorder %v1682_v50, %v147_v20  ;;  %v541_v34 = vld [vmem:[#allocation4 + $0x18] sm:$0xff] }
 0x147   :  { %1180 = vpow2.f32 %v453_v33  ;;  %v1949_v33 = vsub.f32 %v1487_v24, %v1493_v28  ;;  %v297_v24 = vld [vmem:[#allocation3] sm:$0xff] }
 0x148   :  { %459 = vadd.xlane.f32.xlu0 %v1161_v40  ;;  %479 = vadd.xlane.f32.xlu1 %v1163_v51  ;;  %v562_v40 = vsel %vm177_vm13, %v1369_v11, 0.0  ;;  %v538_v51 = vld [vmem:[#allocation4] sm:$0xff] }
 0x149   :  { %v153_v12 = vpop.permute.xlu1 %152 }
 0x14a   :  { %vm179_vm14 = vcmp.eq.s32.totalorder %v1682_v50, %v153_v12 }
 0x14b   :  { %v564_v14 = vsel %vm179_vm14, %v1381_v13, 0.0  ;;  %v542_v13 = vld [vmem:[#allocation4 + $0x20] sm:$0xff] }
 0x14c   :  { %461 = vadd.xlane.f32.xlu0 %v1165_v8  ;;  %483 = vadd.xlane.f32.xlu1 %v1167_v21  ;;  %v540_v8 = vld [vmem:[#allocation4 + $0x10] sm:$0xff] }
 0x14d   :  { %v159_v32 = vpop.permute.xlu1 %158 }
 0x14e   :  { %vm181_vm15 = vcmp.eq.s32.totalorder %v1682_v50, %v159_v32 }
 0x14f   :  { %v1177_v2 = vpop.eup %1176  ;;  %v566_v35 = vsel %vm181_vm15, %v1393_v15, 0.0  ;;  %v539_v15 = vld [vmem:[#allocation4 + $0x8] sm:$0xff] }
 0x150   :  { %465 = vadd.xlane.f32.xlu0 %v1169_v49  ;;  %487 = vadd.xlane.f32.xlu1 %v1171_v3  ;;  %v1179_v10 = vpop.eup %1178 }
 0x151   :  { %v1181_v7 = vpop.eup %1180  ;;  %v165_v17 = vpop.permute.xlu1 %164 }
 0x152   :  { %vm183_vm1 = vcmp.eq.s32.totalorder %v1682_v50, %v165_v17 }
 0x153   :  { %v568_v21 = vsel %vm183_vm1, %v1469_v18, 0.0 }
 0x154   :  { %469 = vadd.xlane.f32.xlu0 %v1173_v19  ;;  %588 = vadd.xlane.f32.xlu1 %v563_v57 }
 0x158   :  { %473 = vadd.xlane.f32.xlu0 %v1175_v0  ;;  %592 = vadd.xlane.f32.xlu1 %v565_v58  ;;  %v265_v0 = vmul.f32 1.442695, %v1949_v33  ;;  %v1950_v58 = vsub.f32 %v1495_v29, %v1512_v36  ;;  %v1953_v29 = vsub.f32 %v1558_v55, %v1572_v61  ;;  %v308_v33 = vld [vmem:[#allocation3 + $0x58] sm:$0xff] }
 0x15a   :  { %1182 = vpow2.f32 %v265_v0  ;;  %v271_v59 = vmul.f32 1.442695, %v1950_v58  ;;  %v283_v36 = vmul.f32 1.442695, %v1953_v29  ;;  %v298_v0 = vld [vmem:[#allocation3 + $0x8] sm:$0xff] }
 0x15c   :  { %477 = vadd.xlane.f32.xlu0 %v1177_v2  ;;  %596 = vadd.xlane.f32.xlu1 %v567_v5  ;;  %1184 = vpow2.f32 %v271_v59  ;;  %v1951_v2 = vsub.f32 %v1517_v38, %v1534_v45  ;;  %v1952_v5 = vsub.f32 %v1539_v47, %v1553_v53  ;;  %v1954_v47 = vsub.f32 %v1497_v30, %v1515_v37 }
 0x15d   :  { %v1957_v30 = vsub.f32 %v1597_v26, %v1612_v44 }
 0x15e   :  { %v275_v20 = vmul.f32 1.442695, %v1951_v2  ;;  %v267_v53 = vmul.f32 1.442695, %v1954_v47 }
 0x15f   :  { %v291_v37 = vmul.f32 1.442695, %v1957_v30  ;;  %v1963_v30 = vld [vmem:[#allocation9_spill] sm:$0xff] }
 0x160   :  { %481 = vadd.xlane.f32.xlu0 %v1179_v10  ;;  %600 = vadd.xlane.f32.xlu1 %v569_v6  ;;  %1186 = vpow2.f32 %v275_v20  ;;  %v279_v10 = vmul.f32 1.442695, %v1952_v5  ;;  %v545_v6 = vld [vmem:[#allocation4 + $0x38] sm:$0xff] }
 0x162   :  { %1188 = vpow2.f32 %v279_v10 }
 0x163   :  { %1190 = vpow2.f32 %v283_v36 }
 0x164   :  { %485 = vadd.xlane.f32.xlu0 %v1181_v7  ;;  %v1183_v12 = vpop.eup %1182  ;;  %1192 = vpow2.f32 %v267_v53 }
 0x165   :  { %v313_v32 = vmul.f32 %v1183_v12, %v297_v24  ;;  %v310_v24 = vld [vmem:[#allocation3 + $0x68] sm:$0xff] }
 0x166   :  { %v1185_v38 = vpop.eup %1184 }
 0x168   :  { %586 = vadd.xlane.f32.xlu0 %v562_v40  ;;  %v300_v40 = vld [vmem:[#allocation3 + $0x18] sm:$0xff] }
 0x169   :  { %v316_v55 = vmul.f32 %v1185_v38, %v300_v40 }
 0x16a   :  { %v1187_v61 = vpop.eup %1186 }
 0x16c   :  { %590 = vadd.xlane.f32.xlu0 %v564_v14 }
 0x16e   :  { %v571_v31 = vpop.xlane.xlu0 %570 }
 0x16f   :  { %v602_v42 = vadd.f32 %v571_v31, %v538_v51  ;;  %v1955_v51 = vsub.f32 %v1577_v63, %v1592_v22  ;;  %v1189_v22 = vpop.eup %1188 }
 0x170   :  { %594 = vadd.xlane.f32.xlu0 %v566_v35  ;;  %v302_v35 = vld [vmem:[#allocation3 + $0x28] sm:$0xff]  ;;  %v1191_v44 = vpop.eup %1190 }
 0x171   :  { %618 = vst.msk [vmem:[#allocation4] sm:$0xff] %vm19_vm0, %v602_v42  ;;  %v287_v17 = vmul.f32 1.442695, %v1955_v51  ;;  %v1956_v42 = vsub.f32 %v1485_v23, %v1490_v27  ;;  %v318_v63 = vmul.f32 %v1187_v61, %v302_v35  ;;  %v1959_v27 = vsub.f32 %v1617_v52, %v1635_v16  ;;  %v312_v61 = vld [vmem:[#allocation3 + $0x78] sm:$0xff] }
 0x172   :  { %v575_v11 = vpop.xlane.xlu0 %574 }
 0x173   :  { %v604_v9 = vadd.f32 %v575_v11, %v540_v8  ;;  %v269_v8 = vmul.f32 1.442695, %v1956_v42  ;;  %1194 = vpow2.f32 %v287_v17 }
 0x174   :  { %598 = vadd.xlane.f32.xlu0 %v568_v21 }
 0x175   :  { %620 = vst.msk [vmem:[#allocation4 + $0x10] sm:$0xff] %vm19_vm0, %v604_v9  ;;  %v304_v9 = vld [vmem:[#allocation3 + $0x38] sm:$0xff]  ;;  %1196 = vpow2.f32 %v269_v8 }
 0x176   :  { %v579_v60 = vpop.xlane.xlu0 %578  ;;  %1198 = vpow2.f32 %v291_v37  ;;  %v320_v26 = vmul.f32 %v1189_v22, %v304_v9  ;;  %v1964_v37 = vld [vmem:[#allocation10_spill] sm:$0xff] }
 0x177   :  { %v606_v43 = vadd.f32 %v579_v60, %v542_v13  ;;  %v1958_v13 = vsub.f32 %v1519_v39, %v1537_v46  ;;  %v1960_v39 = vsub.f32 %v1541_v48, %v1556_v54  ;;  %v1961_v48 = vsub.f32 %v1560_v56, %v1575_v62 }
 0x178   :  { %v1962_v56 = vsub.f32 %v1579_v4, %v1595_v25  ;;  %v717_v8 = vld [vmem:[#allocation4] sm:$0xff] }
 0x179   :  { %622 = vst.msk [vmem:[#allocation4 + $0x20] sm:$0xff] %vm19_vm0, %v606_v43  ;;  %v273_v60 = vmul.f32 1.442695, %v1958_v13  ;;  %v295_v43 = vmul.f32 1.442695, %v1959_v27  ;;  %v640_v27 = vld [vmem:[#allocation2 + $0x18] sm:$0xff] }
 0x17a   :  { %v277_v46 = vmul.f32 1.442695, %v1960_v39  ;;  %v281_v54 = vmul.f32 1.442695, %v1961_v48  ;;  %v285_v62 = vmul.f32 1.442695, %v1962_v56 }
 0x17b   :  { %v1966_v39 = vld [vmem:[#allocation11_spill] sm:$0xff] }
 0x183   :  { %v573_v49 = vpop.xlane.xlu1 %572 }
 0x184   :  { %v603_v3 = vadd.f32 %v573_v49, %v539_v15 }
 0x186   :  { %619 = vst.msk [vmem:[#allocation4 + $0x8] sm:$0xff] %vm19_vm0, %v603_v3  ;;  %v306_v3 = vld [vmem:[#allocation3 + $0x48] sm:$0xff] }
 0x187   :  { %v322_v16 = vmul.f32 %v1191_v44, %v306_v3 }
 0x1a5   :  { %v577_v41 = vpop.xlane.xlu1 %576 }
 0x1a6   :  { %v605_v19 = vadd.f32 %v577_v41, %v541_v34  ;;  %v544_v41 = vld [vmem:[#allocation4 + $0x30] sm:$0xff] }
 0x1a8   :  { %621 = vst.msk [vmem:[#allocation4 + $0x18] sm:$0xff] %vm19_vm0, %v605_v19 }
 0x1a9   :  { %v581_v18 = vpop.xlane.xlu1 %580 }
 0x1aa   :  { %v607_v57 = vadd.f32 %v581_v18, %v543_v1  ;;  %v1193_v1 = vpop.eup %1192 }
 0x1ab   :  { %v1195_v52 = vpop.eup %1194  ;;  %v314_v10 = vmul.f32 %v1193_v1, %v298_v0 }
 0x1ac   :  { %623 = vst.msk [vmem:[#allocation4 + $0x28] sm:$0xff] %vm19_vm0, %v607_v57  ;;  %v1197_v20 = vpop.eup %1196  ;;  %v324_v5 = vmul.f32 %v1195_v52, %v308_v33 }
 0x1af   :  { %v720_v52 = vld [vmem:[#allocation4 + $0x18] sm:$0xff] }
 0x1bd   :  { %v585_v7 = vpop.xlane.xlu1 %584 }
 0x1be   :  { %v609_v28 = vadd.f32 %v585_v7, %v545_v6  ;;  %v1199_v6 = vpop.eup %1198 }
 0x1bf   :  { %v326_v47 = vmul.f32 %v1199_v6, %v310_v24  ;;  %v305_v6 = vld [vmem:[#allocation3 + $0x40] sm:$0xff] }
 0x1c0   :  { %625 = vst.msk [vmem:[#allocation4 + $0x38] sm:$0xff] %vm19_vm0, %v609_v28  ;;  %v299_v28 = vld [vmem:[#allocation3 + $0x10] sm:$0xff] }
 0x1c1   :  { %v458_v45 = vpop.xlane.xlu1 %457  ;;  %v315_v53 = vmul.f32 %v1197_v20, %v299_v28 }
 0x1c2   :  { %v489_v14 = vadd.f32 %v458_v45, %v313_v32 }
 0x1c4   :  { %506 = vst.msk [vmem:[#allocation3] sm:$0xff] %vm19_vm0, %v489_v14  ;;  %v637_v14 = vld [vmem:[#allocation2] sm:$0xff] }
 0x1c5   :  { %v464_v31 = vpop.xlane.xlu1 %463 }
 0x1c6   :  { %v492_v11 = vadd.f32 %v464_v31, %v316_v55  ;;  %v301_v31 = vld [vmem:[#allocation3 + $0x20] sm:$0xff] }
 0x1c8   :  { %509 = vst.msk [vmem:[#allocation3 + $0x18] sm:$0xff] %vm19_vm0, %v492_v11  ;;  %v749_v11 = vld [vmem:[%s1936_s2] sm:$0xff] }
 0x1c9   :  { %v468_v21 = vpop.xlane.xlu1 %467 }
 0x1ca   :  { %v494_v23 = vadd.f32 %v468_v21, %v318_v63  ;;  %v1965_v63 = vsub.f32 %v1963_v30, %v1964_v37 }
 0x1cb   :  { %v653_v15 = vld [vmem:[#allocation3] sm:$0xff] }
 0x1cc   :  { %511 = vst.msk [vmem:[#allocation3 + $0x28] sm:$0xff] %vm19_vm0, %v494_v23  ;;  %1200 = vlog2.f32 %v653_v15  ;;  %v289_v22 = vmul.f32 1.442695, %v1965_v63 }
 0x1cd   :  { %v472_v49 = vpop.xlane.xlu1 %471  ;;  %1202 = vpow2.f32 %v273_v60 }
 0x1ce   :  { %v496_v34 = vadd.f32 %v472_v49, %v320_v26  ;;  %1204 = vpow2.f32 %v295_v43  ;;  %v303_v49 = vld [vmem:[#allocation3 + $0x30] sm:$0xff] }
 0x1cf   :  { %v656_v19 = vld [vmem:[#allocation3 + $0x18] sm:$0xff] }
 0x1d0   :  { %513 = vst.msk [vmem:[#allocation3 + $0x38] sm:$0xff] %vm19_vm0, %v496_v34  ;;  %1206 = vlog2.f32 %v656_v19 }
 0x1d1   :  { %v476_v18 = vpop.xlane.xlu1 %475  ;;  %v583_v57 = vpop.xlane.xlu0 %582  ;;  %1208 = vpow2.f32 %v277_v46  ;;  %v1967_v46 = vld [vmem:[#allocation12_spill] sm:$0xff] }
 0x1d2   :  { %v498_v58 = vadd.f32 %v476_v18, %v322_v16  ;;  %v608_v59 = vadd.f32 %v583_v57, %v544_v41  ;;  %v1968_v41 = vsub.f32 %v1966_v39, %v1967_v46  ;;  %v752_v18 = vld [vmem:[%s1936_s2 + $0x18] sm:$0xff]  ;;  %v547_v57 = vld [vmem:[#allocation4 + $0x48] sm:$0xff] }
 0x1d3   :  { %v658_v2 = vld [vmem:[#allocation3 + $0x28] sm:$0xff] }
 0x1d4   :  { %515 = vst.msk [vmem:[#allocation3 + $0x48] sm:$0xff] %vm19_vm0, %v498_v58  ;;  %624 = vst.msk [vmem:[#allocation4 + $0x30] sm:$0xff] %vm19_vm0, %v608_v59  ;;  %1210 = vlog2.f32 %v658_v2  ;;  %v293_v19 = vmul.f32 1.442695, %v1968_v41  ;;  %v758_v39 = vld [vmem:[%s1936_s2 + $0x48] sm:$0xff] }
 0x1d5   :  { %v480_v12 = vpop.xlane.xlu1 %479  ;;  %v460_v7 = vpop.xlane.xlu0 %459  ;;  %1212 = vpow2.f32 %v281_v54  ;;  %v642_v54 = vld [vmem:[#allocation2 + $0x28] sm:$0xff] }
 0x1d6   :  { %v1201_v29 = vpop.eup %1200  ;;  %v500_v36 = vadd.f32 %v480_v12, %v324_v5  ;;  %v490_v32 = vadd.f32 %v460_v7, %v314_v10 }
 0x1d7   :  { %v670_v38 = vmul.f32 0.6931472, %v1201_v29  ;;  %v660_v45 = vld [vmem:[#allocation3 + $0x38] sm:$0xff]  ;;  %v1203_v40 = vpop.eup %1202  ;;  %v722_v29 = vld [vmem:[#allocation4 + $0x28] sm:$0xff] }
 0x1d8   :  { %517 = vst.msk [vmem:[#allocation3 + $0x58] sm:$0xff] %vm19_vm0, %v500_v36  ;;  %507 = vst.msk [vmem:[#allocation3 + $0x8] sm:$0xff] %vm19_vm0, %v490_v32  ;;  %1214 = vlog2.f32 %v660_v45  ;;  %v1205_v51 = vpop.eup %1204  ;;  %v317_v23 = vmul.f32 %v1203_v40, %v301_v31  ;;  %v754_v36 = vld [vmem:[%s1936_s2 + $0x28] sm:$0xff]  ;;  %v549_v32 = vld [vmem:[#allocation4 + $0x58] sm:$0xff] }
 0x1d9   :  { %v484_v17 = vpop.xlane.xlu1 %483  ;;  %v462_v55 = vpop.xlane.xlu0 %461  ;;  %v701_v35 = vadd.f32 %v670_v38, %v637_v14  ;;  %1216 = vpow2.f32 %v285_v62  ;;  %v328_v60 = vmul.f32 %v1205_v51, %v312_v61 }
 0x1da   :  { %v1207_v42 = vpop.eup %1206  ;;  %v502_v4 = vadd.f32 %v484_v17, %v326_v47  ;;  %v491_v25 = vadd.f32 %v462_v55, %v315_v53  ;;  %v644_v47 = vld [vmem:[#allocation2 + $0x38] sm:$0xff]  ;;  %v307_v55 = vld [vmem:[#allocation3 + $0x50] sm:$0xff] }
 0x1db   :  { %v733_v21 = vsub.f32 %v701_v35, %v717_v8  ;;  %v676_v9 = vmul.f32 0.6931472, %v1207_v42  ;;  %v662_v13 = vld [vmem:[#allocation3 + $0x48] sm:$0xff]  ;;  %v1209_v43 = vpop.eup %1208 }
 0x1dc   :  { %519 = vst.msk [vmem:[#allocation3 + $0x68] sm:$0xff] %vm19_vm0, %v502_v4  ;;  %508 = vst.msk [vmem:[#allocation3 + $0x10] sm:$0xff] %vm19_vm0, %v491_v25  ;;  %1218 = vlog2.f32 %v662_v13  ;;  %v319_v48 = vmul.f32 %v1209_v43, %v303_v49  ;;  %v724_v4 = vld [vmem:[#allocation4 + $0x38] sm:$0xff]  ;;  %v551_v8 = vld [vmem:[#allocation4 + $0x68] sm:$0xff] }
 0x1dd   :  { %v488_v15 = vpop.xlane.xlu1 %487  ;;  %v466_v26 = vpop.xlane.xlu0 %465  ;;  %v765_v44 = vmul.f32 %v749_v11, %v733_v21  ;;  %v704_v3 = vadd.f32 %v676_v9, %v640_v27  ;;  %1220 = vpow2.f32 %v289_v22  ;;  %v756_v25 = vld [vmem:[%s1936_s2 + $0x38] sm:$0xff]  ;;  %v646_v21 = vld [vmem:[#allocation2 + $0x48] sm:$0xff]  ;;  %v309_v27 = vld [vmem:[#allocation3 + $0x60] sm:$0xff] }
 0x1de   :  { %v1211_v34 = vpop.eup %1210  ;;  %v504_v1 = vadd.f32 %v488_v15, %v328_v60  ;;  %v493_v16 = vadd.f32 %v466_v26, %v317_v23  ;;  %v553_v49 = vld [vmem:[#allocation4 + $0x78] sm:$0xff] }
 0x1df   :  { %868 = vperm.xlu0 %1149, %v765_v44   ;;  %v736_v33 = vsub.f32 %v704_v3, %v720_v52  ;;  %v680_v0 = vmul.f32 0.6931472, %v1211_v34  ;;  %v654_v58 = vld [vmem:[#allocation3 + $0x8] sm:$0xff]  ;;  %v664_v59 = vld [vmem:[#allocation3 + $0x58] sm:$0xff]  ;;  %v1213_v2 = vpop.eup %1212 }
 0x1e0   :  { %521 = vst.msk [vmem:[#allocation3 + $0x78] sm:$0xff] %vm19_vm0, %v504_v1  ;;  %510 = vst.msk [vmem:[#allocation3 + $0x20] sm:$0xff] %vm19_vm0, %v493_v16  ;;  %1222 = vlog2.f32 %v654_v58  ;;  %v321_v40 = vmul.f32 %v1213_v2, %v305_v6  ;;  %v638_v16 = vld [vmem:[#allocation2 + $0x8] sm:$0xff] }
 0x1e1   :  { %v589_v20 = vpop.xlane.xlu1 %588  ;;  %v470_v5 = vpop.xlane.xlu0 %469  ;;  %v768_v10 = vmul.f32 %v752_v18, %v736_v33  ;;  %v706_v12 = vadd.f32 %v680_v0, %v642_v54  ;;  %1224 = vlog2.f32 %v664_v59  ;;  %v311_v0 = vld [vmem:[#allocation3 + $0x70] sm:$0xff]  ;;  %v648_v59 = vld [vmem:[#allocation2 + $0x58] sm:$0xff] }
 0x1e2   :  { %v1215_v7 = vpop.eup %1214  ;;  %v611_v24 = vadd.f32 %v589_v20, %v547_v57  ;;  %v495_v28 = vadd.f32 %v470_v5, %v319_v48  ;;  %1226 = vpow2.f32 %v293_v19  ;;  %v718_v5 = vld [vmem:[#allocation4 + $0x8] sm:$0xff] }
 0x1e3   :  { %883 = vperm.xlu0 %1149, %v768_v10   ;;  %v738_v56 = vsub.f32 %v706_v12, %v722_v29  ;;  %v684_v62 = vmul.f32 0.6931472, %v1215_v7  ;;  %v655_v38 = vld [vmem:[#allocation3 + $0x10] sm:$0xff]  ;;  %v666_v45 = vld [vmem:[#allocation3 + $0x68] sm:$0xff]  ;;  %v1217_v53 = vpop.eup %1216 }
 0x1e4   :  { %627 = vst.msk [vmem:[#allocation4 + $0x48] sm:$0xff] %vm19_vm0, %v611_v24  ;;  %512 = vst.msk [vmem:[#allocation3 + $0x30] sm:$0xff] %vm19_vm0, %v495_v28  ;;  %1228 = vlog2.f32 %v655_v38  ;;  %v323_v22 = vmul.f32 %v1217_v53, %v307_v55  ;;  %v750_v10 = vld [vmem:[%s1936_s2 + $0x8] sm:$0xff]  ;;  %v760_v28 = vld [vmem:[%s1936_s2 + $0x58] sm:$0xff] }
 0x1e5   :  { %v593_v14 = vpop.xlane.xlu1 %592  ;;  %v474_v51 = vpop.xlane.xlu0 %473  ;;  %v770_v17 = vmul.f32 %v754_v36, %v738_v56  ;;  %v708_v61 = vadd.f32 %v684_v62, %v644_v47  ;;  %1230 = vlog2.f32 %v666_v45  ;;  %v639_v62 = vld [vmem:[#allocation2 + $0x10] sm:$0xff]  ;;  %v650_v53 = vld [vmem:[#allocation2 + $0x68] sm:$0xff]  ;;  %v546_v55 = vld [vmem:[#allocation4 + $0x40] sm:$0xff] }
 0x1e6   :  { %v1219_v31 = vpop.eup %1218  ;;  %v613_v35 = vadd.f32 %v593_v14, %v549_v32  ;;  %v497_v42 = vadd.f32 %v474_v51, %v321_v40 }
 0x1e7   :  { %893 = vperm.xlu0 %1149, %v770_v17   ;;  %v740_v11 = vsub.f32 %v708_v61, %v724_v4  ;;  %v688_v30 = vmul.f32 0.6931472, %v1219_v31  ;;  %v657_v37 = vld [vmem:[#allocation3 + $0x20] sm:$0xff]  ;;  %v668_v63 = vld [vmem:[#allocation3 + $0x78] sm:$0xff]  ;;  %v1221_v9 = vpop.eup %1220  ;;  %v719_v61 = vld [vmem:[#allocation4 + $0x10] sm:$0xff] }
 0x1e8   :  { %629 = vst.msk [vmem:[#allocation4 + $0x58] sm:$0xff] %vm19_vm0, %v613_v35  ;;  %514 = vst.msk [vmem:[#allocation3 + $0x40] sm:$0xff] %vm19_vm0, %v497_v42  ;;  %1232 = vlog2.f32 %v657_v37  ;;  %v325_v19 = vmul.f32 %v1221_v9, %v309_v27  ;;  %v751_v31 = vld [vmem:[%s1936_s2 + $0x10] sm:$0xff] }
 0x1e9   :  { %v597_v13 = vpop.xlane.xlu1 %596  ;;  %v478_v60 = vpop.xlane.xlu0 %477  ;;  %v772_v23 = vmul.f32 %v756_v25, %v740_v11  ;;  %v710_v43 = vadd.f32 %v688_v30, %v646_v21  ;;  %1234 = vlog2.f32 %v668_v63  ;;  %v641_v63 = vld [vmem:[#allocation2 + $0x20] sm:$0xff] }
 0x1ea   :  { %v1223_v15 = vpop.eup %1222  ;;  %v615_v26 = vadd.f32 %v597_v13, %v551_v8  ;;  %v499_v44 = vadd.f32 %v478_v60, %v323_v22  ;;  %v762_v8 = vld [vmem:[%s1936_s2 + $0x68] sm:$0xff]  ;;  %v652_v60 = vld [vmem:[#allocation2 + $0x78] sm:$0xff] }
 0x1eb   :  { %v1225_v3 = vpop.eup %1224  ;;  %903 = vperm.xlu0 %1149, %v772_v23   ;;  %v726_v34 = vld [vmem:[#allocation4 + $0x48] sm:$0xff]  ;;  %v672_v46 = vmul.f32 0.6931472, %v1223_v15  ;;  %v659_v41 = vld [vmem:[#allocation3 + $0x30] sm:$0xff] }
 0x1ec   :  { %631 = vst.msk [vmem:[#allocation4 + $0x68] sm:$0xff] %vm19_vm0, %v615_v26  ;;  %516 = vst.msk [vmem:[#allocation3 + $0x50] sm:$0xff] %vm19_vm0, %v499_v44  ;;  %v742_v1 = vsub.f32 %v710_v43, %v726_v34  ;;  %v692_v52 = vmul.f32 0.6931472, %v1225_v3  ;;  %1236 = vlog2.f32 %v659_v41  ;;  %v1227_v18 = vpop.eup %1226  ;;  %v548_v15 = vld [vmem:[#allocation4 + $0x50] sm:$0xff]  ;;  %v721_v26 = vld [vmem:[#allocation4 + $0x20] sm:$0xff] }
 0x1ed   :  { %v601_v57 = vpop.xlane.xlu1 %600  ;;  %v482_v33 = vpop.xlane.xlu0 %481  ;;  %v702_v58 = vadd.f32 %v672_v46, %v638_v16  ;;  %v327_v32 = vmul.f32 %v1227_v18, %v311_v0  ;;  %v753_v44 = vld [vmem:[%s1936_s2 + $0x20] sm:$0xff]  ;;  %v1273_v3 = vmov 0.0|0.0   ;;  %v764_v46 = vld [vmem:[%s1936_s2 + $0x78] sm:$0xff]  ;;  %v643_v16 = vld [vmem:[#allocation2 + $0x30] sm:$0xff] }
 0x1ee   :  { %v1229_v48 = vpop.eup %1228  ;;  %v617_v54 = vadd.f32 %v601_v57, %v553_v49  ;;  %v501_v2 = vadd.f32 %v482_v33, %v325_v19  ;;  %v774_v20 = vmul.f32 %v758_v39, %v742_v1  ;;  %v712_v6 = vadd.f32 %v692_v52, %v648_v59  ;;  %1117 = vmatprep.subr.bf16.mxu0 %v1273_v3  ;;  %v723_v59 = vld [vmem:[#allocation4 + $0x30] sm:$0xff] }
 0x1ef   :  { %v1231_v12 = vpop.eup %1230  ;;  %v734_v7 = vsub.f32 %v702_v58, %v718_v5  ;;  %v728_v24 = vld [vmem:[#allocation4 + $0x58] sm:$0xff]  ;;  %v674_v29 = vmul.f32 0.6931472, %v1229_v48  ;;  %v661_v36 = vld [vmem:[#allocation3 + $0x40] sm:$0xff]  ;;  %v755_v48 = vld [vmem:[%s1936_s2 + $0x30] sm:$0xff] }
 0x1f0   :  { %633 = vst.msk [vmem:[#allocation4 + $0x78] sm:$0xff] %vm19_vm0, %v617_v54  ;;  %518 = vst.msk [vmem:[#allocation3 + $0x60] sm:$0xff] %vm19_vm0, %v501_v2  ;;  %913 = vperm.xlu0 %1149, %v774_v20   ;;  %v744_v56 = vsub.f32 %v712_v6, %v728_v24  ;;  %v696_v38 = vmul.f32 0.6931472, %v1231_v12  ;;  %1238 = vlog2.f32 %v661_v36  ;;  %v550_v54 = vld [vmem:[#allocation4 + $0x60] sm:$0xff] }
 0x1f1   :  { %v486_v45 = vpop.xlane.xlu0 %485  ;;  %v766_v40 = vmul.f32 %v750_v10, %v734_v7  ;;  %v703_v47 = vadd.f32 %v674_v29, %v639_v62  ;;  %v645_v10 = vld [vmem:[#allocation2 + $0x40] sm:$0xff]  ;;  %v552_v29 = vld [vmem:[#allocation4 + $0x70] sm:$0xff] }
 0x1f2   :  { %v1233_v14 = vpop.eup %1232  ;;  %v503_v51 = vadd.f32 %v486_v45, %v327_v32  ;;  %v776_v17 = vmul.f32 %v760_v28, %v744_v56  ;;  %v714_v35 = vadd.f32 %v696_v38, %v650_v53  ;;  %v757_v32 = vld [vmem:[%s1936_s2 + $0x40] sm:$0xff]  ;;  %v647_v38 = vld [vmem:[#allocation2 + $0x50] sm:$0xff] }
 0x1f3   :  { %v1235_v42 = vpop.eup %1234  ;;  %873 = vperm.xlu1 %1148, %v766_v40   ;;  %v735_v4 = vsub.f32 %v703_v47, %v719_v61  ;;  %v730_v25 = vld [vmem:[#allocation4 + $0x68] sm:$0xff]  ;;  %v678_v11 = vmul.f32 0.6931472, %v1233_v14  ;;  %v663_v30 = vld [vmem:[#allocation3 + $0x50] sm:$0xff] }
 0x1f4   :  { %520 = vst.msk [vmem:[#allocation3 + $0x70] sm:$0xff] %vm19_vm0, %v503_v51  ;;  %923 = vperm.xlu0 %1149, %v776_v17   ;;  %v746_v37 = vsub.f32 %v714_v35, %v730_v25  ;;  %v700_v22 = vmul.f32 0.6931472, %v1235_v42  ;;  %1240 = vlog2.f32 %v663_v30  ;;  %v759_v17 = vld [vmem:[%s1936_s2 + $0x50] sm:$0xff] }
 0x1f5   :  { %v587_v21 = vpop.xlane.xlu0 %586  ;;  %v767_v9 = vmul.f32 %v751_v31, %v735_v4  ;;  %v705_v13 = vadd.f32 %v678_v11, %v641_v63  ;;  %v649_v31 = vld [vmem:[#allocation2 + $0x60] sm:$0xff] }
 0x1f6   :  { %v1237_v23 = vpop.eup %1236  ;;  %v610_v27 = vadd.f32 %v587_v21, %v546_v55  ;;  %v778_v43 = vmul.f32 %v762_v8, %v746_v37  ;;  %v716_v49 = vadd.f32 %v700_v22, %v652_v60  ;;  %v761_v8 = vld [vmem:[%s1936_s2 + $0x60] sm:$0xff]  ;;  %v651_v37 = vld [vmem:[#allocation2 + $0x70] sm:$0xff] }
 0x1f7   :  { %878 = vperm.xlu1 %1148, %v767_v9   ;;  %v737_v34 = vsub.f32 %v705_v13, %v721_v26  ;;  %v732_v39 = vld [vmem:[#allocation4 + $0x78] sm:$0xff]  ;;  %v682_v41 = vmul.f32 0.6931472, %v1237_v23  ;;  %v665_v19 = vld [vmem:[#allocation3 + $0x60] sm:$0xff]  ;;  %v763_v9 = vld [vmem:[%s1936_s2 + $0x70] sm:$0xff]  ;;  %v1969_v23 = vmov 0.0  }
 0x1f8   :  { %626 = vst.msk [vmem:[#allocation4 + $0x40] sm:$0xff] %vm19_vm0, %v610_v27  ;;  %933 = vperm.xlu0 %1149, %v778_v43   ;;  %v748_v1 = vsub.f32 %v716_v49, %v732_v39  ;;  %1242 = vlog2.f32 %v665_v19  ;;  %v1970_v27 = vlaneseq  ;;  %s1276_s2 = smov [#allocation6]  }
 0x1f9   :  { %v591_v52 = vpop.xlane.xlu0 %590  ;;  %v769_v18 = vmul.f32 %v753_v44, %v737_v34  ;;  %v707_v57 = vadd.f32 %v682_v41, %v643_v16  ;;  %s1039_s0 = sshll.u32 %s1276_s2, 4  ;;  %s1040_s0 = int_to_ptr.vmem [resolvable:$true] %s1039_s0 }
 0x1fa   :  { %v1239_v33 = vpop.eup %1238  ;;  %v612_v0 = vadd.f32 %v591_v52, %v548_v15  ;;  %v780_v58 = vmul.f32 %v764_v46, %v748_v1  ;;  %v1863_v43 = vshrl.u32 %v1970_v27, 7  ;;  %s1246_s23 = scalar_lea.vmem %s1040_s0, 16  ;;  %s1250_s24 = scalar_lea.vmem %s1040_s0, 32 }
 0x1fb   :  { %888 = vperm.xlu1 %1148, %v769_v18   ;;  %v739_v2 = vsub.f32 %v707_v57, %v723_v59  ;;  %v686_v20 = vmul.f32 0.6931472, %v1239_v33  ;;  %v667_v5 = vld [vmem:[#allocation3 + $0x70] sm:$0xff]  ;;  %p1247_p0 = scmp.ne.s32.totalorder %s1040_s0, %s1246_s23  ;;  %p1251_p1 = scmp.lt.s32.totalorder %s1040_s0, %s1040_s0 }
 0x1fc   :  { %628 = vst.msk [vmem:[#allocation4 + $0x50] sm:$0xff] %vm19_vm0, %v612_v0  ;;  %943 = vperm.xlu0 %1149, %v780_v58   ;;  %1244 = vlog2.f32 %v667_v5  ;;  %v783_v26 = vadd.s32 8, %v1863_v43  ;;  %v798_v44 = vand.u32 127, %v1863_v43  ;;  %v785_v49 = vadd.s32 24, %v1863_v43  ;;  %p1252_p2 = scmp.lt.s32.totalorder %s1250_s24, %s1246_s23 }
 0x1fd   :  { %v595_v6 = vpop.xlane.xlu0 %594  ;;  %v771_v12 = vmul.f32 %v755_v48, %v739_v2  ;;  %v709_v7 = vadd.f32 %v686_v20, %v645_v10  ;;  %v784_v46 = vadd.s32 16, %v1863_v43  ;;  %v787_v41 = vadd.s32 40, %v1863_v43 }
 0x1fe   :  { %v1241_v24 = vpop.eup %1240  ;;  %v614_v28 = vadd.f32 %v595_v6, %v550_v54  ;;  %v799_v39 = vand.u32 127, %v783_v26  ;;  %vm814_vm2 = vcmp.eq.s32.totalorder %v798_v44, %v1682_v50  ;;  %v801_v19 = vand.u32 127, %v785_v49  ;;  %p1253_p3 = por %p1252_p2, %p1251_p1 }
 0x1ff   :  { %898 = vperm.xlu1 %1148, %v771_v12   ;;  %v725_v36 = vld [vmem:[#allocation4 + $0x40] sm:$0xff]  ;;  %v690_v56 = vmul.f32 0.6931472, %v1241_v24  ;;  %v800_v1 = vand.u32 127, %v784_v46  ;;  %v786_v16 = vadd.s32 32, %v1863_v43  ;;  %v1047_v18 = vsel %vm814_vm2, 1.0, %v1969_v23 }
 0x200   :  { %630 = vst.msk [vmem:[#allocation4 + $0x60] sm:$0xff] %vm19_vm0, %v614_v28  ;;  %v741_v62 = vsub.f32 %v709_v7, %v725_v36  ;;  %vm815_vm3 = vcmp.eq.s32.totalorder %v799_v39, %v1682_v50  ;;  %v803_v57 = vand.u32 127, %v787_v41  ;;  %v789_v33 = vadd.s32 56, %v1863_v43  ;;  %p1254_p4 = pnand %p1253_p3, %p1247_p0 }
 0x201   :  { %v599_v45 = vpop.xlane.xlu0 %598  ;;  %v711_v40 = vadd.f32 %v690_v56, %v647_v38  ;;  %v1048_v0 = vsel %vm815_vm3, 1.0, %v1969_v23  ;;  %vm817_vm4 = vcmp.eq.s32.totalorder %v801_v19, %v1682_v50  ;;  %vm816_vm5 = vcmp.eq.s32.totalorder %v800_v1, %v1682_v50 }
 0x202   :  { %v1243_v47 = vpop.eup %1242  ;;  %v616_v53 = vadd.f32 %v599_v45, %v552_v29  ;;  %v773_v14 = vmul.f32 %v757_v32, %v741_v62  ;;  %v802_v58 = vand.u32 127, %v786_v16  ;;  %v788_v59 = vadd.s32 48, %v1863_v43 }
 0x203   :  { %v727_v51 = vld [vmem:[#allocation4 + $0x50] sm:$0xff]  ;;  %v694_v55 = vmul.f32 0.6931472, %v1243_v47  ;;  %v1050_v20 = vsel %vm817_vm4, 1.0, %v1969_v23  ;;  %vm819_vm6 = vcmp.eq.s32.totalorder %v803_v57, %v1682_v50  ;;  %v805_v5 = vand.u32 127, %v789_v33 }
 0x204   :  { %632 = vst.msk [vmem:[#allocation4 + $0x70] sm:$0xff] %vm19_vm0, %v616_v53  ;;  %908 = vperm.xlu1 %1148, %v773_v14   ;;  %v743_v61 = vsub.f32 %v711_v40, %v727_v51  ;;  %vm1274_vm0 = vmmov 0   ;;  %v1049_v10 = vsel %vm816_vm5, 1.0, %v1969_v23  ;;  %v791_v12 = vadd.s32 72, %v1863_v43 }
 0x205   :  { %v713_v35 = vadd.f32 %v694_v55, %v649_v31  ;;  %1114 = vmatprep.mubr.msk.f32.mxu0 %vm1274_vm0, %v1969_v23  ;;  %vm818_vm7 = vcmp.eq.s32.totalorder %v802_v58, %v1682_v50  ;;  %v804_v24 = vand.u32 127, %v788_v59  ;;  %v790_v29 = vadd.s32 64, %v1863_v43 }
 0x206   :  { %v1245_v42 = vpop.eup %1244  ;;  %v775_v4 = vmul.f32 %v759_v17, %v743_v61  ;;  %v1052_v56 = vsel %vm819_vm6, 1.0, %v1969_v23  ;;  %vm821_vm8 = vcmp.eq.s32.totalorder %v805_v5, %v1682_v50  ;;  %v1051_v62 = vsel %vm818_vm7, 1.0, %v1969_v23 }
 0x207   :  { %v729_v25 = vld [vmem:[#allocation4 + $0x60] sm:$0xff]  ;;  %v698_v11 = vmul.f32 0.6931472, %v1245_v42  ;;  %v807_v38 = vand.u32 127, %v791_v12  ;;  %v793_v45 = vadd.s32 88, %v1863_v43  ;;  %vm820_vm9 = vcmp.eq.s32.totalorder %v804_v24, %v1682_v50 }
 0x208   :  { %918 = vperm.xlu1 %1148, %v775_v4   ;;  %v745_v30 = vsub.f32 %v713_v35, %v729_v25  ;;  %v806_v53 = vand.u32 127, %v790_v29  ;;  %v792_v14 = vadd.s32 80, %v1863_v43  ;;  %v1054_v61 = vsel %vm821_vm8, 1.0, %v1969_v23 }
 0x209   :  { %v715_v63 = vadd.f32 %v698_v11, %v651_v37  ;;  %v1053_v31 = vsel %vm820_vm9, 1.0, %v1969_v23  ;;  %vm823_vm10 = vcmp.eq.s32.totalorder %v807_v38, %v1682_v50  ;;  %v809_v35 = vand.u32 127, %v793_v45 }
 0x20a   :  { %v777_v22 = vmul.f32 %v761_v8, %v745_v30  ;;  %v795_v42 = vadd.s32 104, %v1863_v43  ;;  %vm822_vm11 = vcmp.eq.s32.totalorder %v806_v53, %v1682_v50  ;;  %v808_v8 = vand.u32 127, %v792_v14 }
 0x20b   :  { %v731_v21 = vld [vmem:[#allocation4 + $0x70] sm:$0xff]  ;;  %v794_v11 = vadd.s32 96, %v1863_v43  ;;  %vm825_vm12 = vcmp.eq.s32.totalorder %v809_v35, %v1682_v50 }
 0x20c   :  { %928 = vperm.xlu1 %1148, %v777_v22   ;;  %v747_v13 = vsub.f32 %v715_v63, %v731_v21  ;;  %v1056_v63 = vsel %vm823_vm10, 1.0, %v1969_v23  ;;  %v811_v21 = vand.u32 127, %v795_v42  ;;  %vm824_vm13 = vcmp.eq.s32.totalorder %v808_v8, %v1682_v50 }
 0x20d   :  { %v810_v27 = vand.u32 127, %v794_v11  ;;  %v1057_v39 = vsel %vm824_vm13, 1.0, %v1969_v23 }
 0x20e   :  { %v779_v60 = vmul.f32 %v763_v9, %v747_v13  ;;  %v1055_v13 = vsel %vm822_vm11, 1.0, %v1969_v23  ;;  %vm827_vm14 = vcmp.eq.s32.totalorder %v811_v21, %v1682_v50 }
 0x20f   :  { %vm826_vm15 = vcmp.eq.s32.totalorder %v810_v27, %v1682_v50  ;;  %v1060_v57 = vsel %vm827_vm14, 1.0, %v1969_v23 }
 0x210   :  { %938 = vperm.xlu1 %1148, %v779_v60   ;;  %v797_v60 = vadd.s32 120, %v1863_v43  ;;  %v1059_v33 = vsel %vm826_vm15, 1.0, %v1969_v23 }
 0x212   :  { %v813_v46 = vand.u32 127, %v797_v60 }
 0x214   :  { %vm829_vm1 = vcmp.eq.s32.totalorder %v813_v46, %v1682_v50 }
 0x25e   :  { %v869_v15 = vpop.permute.xlu0 %868 }
 0x25f   :  { %v946_v54 = vmul.f32 %v1047_v18, %v869_v15  ;;  %v796_v15 = vadd.s32 112, %v1863_v43 }
 0x261   :  { %v812_v19 = vand.u32 127, %v796_v15 }
 0x262   :  { %v884_v34 = vpop.permute.xlu0 %883 }
 0x263   :  { %v949_v36 = vmul.f32 %v1050_v20, %v884_v34  ;;  %v1058_v34 = vsel %vm825_vm12, 1.0, %v1969_v23  ;;  %vm828_vm0 = vcmp.eq.s32.totalorder %v812_v19, %v1682_v50 }
 0x264   :  { %v1061_v20 = vsel %vm828_vm0, 1.0, %v1969_v23 }
 0x266   :  { %v894_v52 = vpop.permute.xlu0 %893 }
 0x267   :  { %v951_v51 = vmul.f32 %v1052_v56, %v894_v52 }
 0x26a   :  { %v904_v6 = vpop.permute.xlu0 %903 }
 0x26b   :  { %v953_v30 = vmul.f32 %v1054_v61, %v904_v6 }
 0x26f   :  { %v914_v17 = vpop.permute.xlu0 %913 }
 0x270   :  { %v955_v44 = vmul.f32 %v1056_v63, %v914_v17 }
 0x272   :  { %v874_v48 = vpop.permute.xlu1 %873 }
 0x273   :  { %v947_v2 = vmul.f32 %v1048_v0, %v874_v48  ;;  %v924_v22 = vpop.permute.xlu0 %923 }
 0x274   :  { %v957_v52 = vmul.f32 %v1058_v34, %v924_v22 }
 0x275   :  { %v1118_v7 = vpack.c.bf16 %v947_v2, %v946_v54  ;;  %v1062_v54 = vsel %vm829_vm1, 1.0, %v1969_v23 }
 0x276   :  { %v879_v28 = vpop.permute.xlu1 %878 }
 0x277   :  { %v948_v32 = vmul.f32 %v1049_v10, %v879_v28  ;;  %1119 = vmatpush3.bf16.msra.mxu0 %v1118_v7  ;;  %v934_v1 = vpop.permute.xlu0 %933  ;;  %v862_v7 = vshra.s32 %v1682_v50, 7  ;;  %v1275_v28 = vmov 1.0  }
 0x278   :  { %1120 = vmatprep.subr.bf16.mxu0 %v1273_v3  ;;  %v959_v59 = vmul.f32 %v1060_v57, %v934_v1 }
 0x279   :  { %v1121_v40 = vpack.c.bf16 %v949_v36, %v948_v32  ;;  %vm863_vm2 = vcmp.eq.s32.totalorder %v862_v7, %v1863_v43 }
 0x27a   :  { %v889_v47 = vpop.permute.xlu1 %888 }
 0x27b   :  { %v950_v55 = vmul.f32 %v1051_v62, %v889_v47  ;;  %1122 = vmatpush3.bf16.msra.mxu0 %v1121_v40  ;;  %v944_v2 = vpop.permute.xlu0 %943 }
 0x27c   :  { %1123 = vmatprep.subr.bf16.mxu0 %v1273_v3  ;;  %v961_v6 = vmul.f32 %v1062_v54, %v944_v2 }
 0x27d   :  { %v1124_v4 = vpack.c.bf16 %v951_v51, %v950_v55 }
 0x27e   :  { %v899_v25 = vpop.permute.xlu1 %898 }
 0x27f   :  { %v952_v37 = vmul.f32 %v1053_v31, %v899_v25  ;;  %1125 = vmatpush3.bf16.msra.mxu0 %v1124_v4 }
 0x280   :  { %1126 = vmatprep.subr.bf16.mxu0 %v1273_v3 }
 0x281   :  { %v1127_v9 = vpack.c.bf16 %v953_v30, %v952_v37 }
 0x283   :  { %v909_v26 = vpop.permute.xlu1 %908  ;;  %1128 = vmatpush3.bf16.msra.mxu0 %v1127_v9 }
 0x284   :  { %v954_v49 = vmul.f32 %v1055_v13, %v909_v26  ;;  %1129 = vmatprep.subr.bf16.mxu0 %v1273_v3 }
 0x286   :  { %v1130_v41 = vpack.c.bf16 %v955_v44, %v954_v49 }
 0x287   :  { %v919_v16 = vpop.permute.xlu1 %918 }
 0x288   :  { %v956_v18 = vmul.f32 %v1057_v39, %v919_v16  ;;  %1131 = vmatpush3.bf16.msra.mxu0 %v1130_v41 }
 0x289   :  { %1132 = vmatprep.subr.bf16.mxu0 %v1273_v3 }
 0x28a   :  { %v1133_v0 = vpack.c.bf16 %v957_v52, %v956_v18 }
 0x28b   :  { %v929_v58 = vpop.permute.xlu1 %928 }
 0x28c   :  { %v958_v48 = vmul.f32 %v1059_v33, %v929_v58  ;;  %1134 = vmatpush3.bf16.msra.mxu0 %v1133_v0 }
 0x28d   :  { %1135 = vmatprep.subr.bf16.mxu0 %v1273_v3 }
 0x28e   :  { %v1136_v5 = vpack.c.bf16 %v959_v59, %v958_v48 }
 0x28f   :  { %v939_v10 = vpop.permute.xlu1 %938 }
 0x290   :  { %v960_v12 = vmul.f32 %v1061_v20, %v939_v10  ;;  %1137 = vmatpush3.bf16.msra.mxu0 %v1136_v5 }
 0x291   :  { %1138 = vmatprep.subr.bf16.mxu0 %v1273_v3 }
 0x292   :  { %v1139_v24 = vpack.c.bf16 %v961_v6, %v960_v12 }
 0x294   :  { %1140 = vmatpush3.bf16.msra.mxu0 %v1139_v24 }
 0x297   :  { %1115 = vmatmul.mubr.msk.f32.vlgmr.msra.gmra.mrb[0].mxu0 %vm863_vm2, %v1275_v28 }
 0x36a   :  { %v1028_v23 = vpop.f32.mrb[0].mxu0 }
 0x36b   :  { %1032 = vst [vmem:[#allocation6] sm:$0x1] %v1028_v23  ;;  %v1116_v29 = vpop.f32.mrb[1].mxu0 }
 0x36c   :  { %1257 = shalt.err (!%p1254_p4)
}
 0x36d   :  { %s1258_s27 = scalar_lea.hbm %s1937_s3, 16 }
 0x36e   :  { %p1259_p5 = scmp.ne.s32.totalorder %s1937_s3, %s1258_s27  ;;  %p1262_p6 = scmp.lt.u32.totalorder %s1258_s27, %s1937_s3 }
 0x370   :  { %p1264_p7 = pnand %p1262_p6, %p1259_p5 }
 0x372   :  { %1267 = shalt.err (!%p1264_p7)
}
 0x373   :  { %1042 = dma.vmem_to_hbm [thread:$0]  %s1040_s0, 16, %s1937_s3, [#allocation7]  }
 0x374   :  { %1268 = dma.done.wait [#allocation7], 16  }
 0x375   :  { %1269 = vsyncadd [#allocation7], 4294967280 }
 0x376   :  { %1046 = vsyncpa [#allocation7], 1 }

</bundles_post_ra>
